<compile_context>
chip_gen: v5e
topology: v5e:2x2
jax: 0.10.0
libtpu: 0.0.40
codegen_flags: <defaults>
</compile_context>

<pallas_src>
import functools

import jax
import jax.numpy as jnp
from jax.experimental import pallas as pl
from jax.experimental.pallas import tpu as pltpu

LANE = 128  # TPU lane width; hidden/output feature axes padded to this.


def _round_up(x: int, m: int) -> int:
    return ((x + m - 1) // m) * m


def _pad2d(x, rows, cols):
    r, c = x.shape
    if r == rows and c == cols:
        return x
    return jnp.pad(x, ((0, rows - r), (0, cols - c)))


def _decoder_kernel(mu_ref, logvar_ref, eps_ref,
                    w1_ref, b1_ref, w2_ref, b2_ref,
                    w3_ref, b3_ref, w4_ref, b4_ref,
                    out_ref, *, final_activation: str):
    f32 = jnp.float32
    # Reparameterisation in f32 (VPU + EUP): z = mu + eps * exp(logvar / 2).
    z = mu_ref[...] + eps_ref[...] * jnp.exp(logvar_ref[...] * 0.5)

    def hidden(x_bf16, w_ref, b_ref):
        # bf16 x bf16 on the MXU with f32 accumulation; bias add in f32 on the
        # MXU output, then ReLU on the bf16 copy handed to the next layer.
        y = jnp.dot(x_bf16, w_ref[...], preferred_element_type=f32)
        return jnp.maximum((y + b_ref[...]).astype(jnp.bfloat16), 0.0)

    h = hidden(z.astype(jnp.bfloat16), w1_ref, b1_ref)
    h = hidden(h, w2_ref, b2_ref)
    h = hidden(h, w3_ref, b3_ref)
    x_raw = jnp.dot(h, w4_ref[...], preferred_element_type=f32) + b4_ref[...]

    if final_activation == "sigmoid":
        # sigmoid(x) = 1 / (1 + exp(-x)); exp and the approximate reciprocal
        # both run on the EUP slot, keeping the wide epilogue off the VALU.
        out = pl.reciprocal(1.0 + jnp.exp(-x_raw), approx=True)
    else:  # "relu"
        out = jnp.maximum(x_raw, 0.0)

    out_ref[...] = out.astype(out_ref.dtype)


def prepare_decoder_params(params):
    """Pad feature axes to lane multiples and cast weights to bf16 ONCE.

    Hoisted out of the per-call path: the padded bf16 weight set lives in HBM
    and is only ever read by the kernel.
    """
    latent, h1 = params["w1"].shape
    h2 = params["w2"].shape[1]
    h3 = params["w3"].shape[1]
    out_dim = params["w4"].shape[1]
    H1p, H2p, H3p, Op = (_round_up(d, LANE) for d in (h1, h2, h3, out_dim))
    f32 = jnp.float32
    prepared = {
        # w1's row (K) axis stays at the true latent size: a block dim equal
        # to the full array dim is legal even when < 128.
        "w1": _pad2d(params["w1"].astype(f32), latent, H1p).astype(jnp.bfloat16),
        "w2": _pad2d(params["w2"].astype(f32), H1p, H2p).astype(jnp.bfloat16),
        "w3": _pad2d(params["w3"].astype(f32), H2p, H3p).astype(jnp.bfloat16),
        "w4": _pad2d(params["w4"].astype(f32), H3p, Op).astype(jnp.bfloat16),
        "b1": _pad2d(params["b1"].reshape(1, -1).astype(f32), 1, H1p),
        "b2": _pad2d(params["b2"].reshape(1, -1).astype(f32), 1, H2p),
        "b3": _pad2d(params["b3"].reshape(1, -1).astype(f32), 1, H3p),
        "b4": _pad2d(params["b4"].reshape(1, -1).astype(f32), 1, Op),
        # Static metadata (python ints) for the forward wrapper.
        "latent_dim": int(latent),
        "hidden_dims": (int(h1), int(h2), int(h3)),
        "output_dim": int(out_dim),
    }
    return prepared


def _pick_batch_tile(batch: int, block_batch: int) -> int:
    """Batch tile: no over-padding for small batches, >=2 steps for v7x."""
    tb = min(block_batch, _round_up(batch, 8))
    # v7x megacore: once the batch is big enough to split, make sure the
    # ("parallel",) batch grid has >= 2 steps so both TensorCores get work.
    if batch > 128 and -(-batch // tb) < 2:
        tb = _round_up(-(-batch // 2), 8)
    return tb


def decoder_forward(mu, logvar, eps, prepared,
                    final_activation: str = "sigmoid",
                    block_batch: int = 256,
                    out_dtype=jnp.float32):
    """Decoder forward pass. mu, logvar, eps: (batch, latent_dim) float32.

    `prepared` must come from prepare_decoder_params(). Set out_dtype to
    jnp.bfloat16 to halve output writeback if the consumer tolerates it.
    """
    assert final_activation in ("sigmoid", "relu")
    batch, latent = mu.shape
    assert latent == prepared["latent_dim"]
    H1p = prepared["w1"].shape[1]
    H2p = prepared["w2"].shape[1]
    H3p = prepared["w3"].shape[1]
    Op = prepared["w4"].shape[1]
    out_dim = prepared["output_dim"]
    h1, h2, h3 = prepared["hidden_dims"]

    TB = _pick_batch_tile(batch, block_batch)
    Bp = _round_up(batch, TB)
    grid = (Bp // TB,)

    f32 = jnp.float32
    # Only the batch axis is (possibly) padded; the latent axis keeps its true
    # size (no 8x lane inflation of the three input streams).
    mu_p = _pad2d(mu.astype(f32), Bp, latent)
    lv_p = _pad2d(logvar.astype(f32), Bp, latent)
    eps_p = _pad2d(eps.astype(f32), Bp, latent)

    w1, b1 = prepared["w1"], prepared["b1"]
    w2, b2 = prepared["w2"], prepared["b2"]
    w3, b3 = prepared["w3"], prepared["b3"]
    w4, b4 = prepared["w4"], prepared["b4"]

    # Activation tiles move with the batch grid (Pallas double-buffers their
    # DMA behind the MXU work); weights/biases use a constant index_map so
    # they stay VMEM-resident across grid steps.
    def act_spec(cols):
        return pl.BlockSpec((TB, cols), lambda i: (i, 0))

    def resident_spec(arr):
        return pl.BlockSpec(arr.shape, lambda i: (0, 0))

    in_specs = [act_spec(latent), act_spec(latent), act_spec(latent),
                resident_spec(w1), resident_spec(b1),
                resident_spec(w2), resident_spec(b2),
                resident_spec(w3), resident_spec(b3),
                resident_spec(w4), resident_spec(b4)]
    out_specs = act_spec(Op)

    # VMEM budget from the actual footprint: double-buffered weights/biases
    # and activation tiles + live intermediates, with ~1.5x headroom, capped
    # at ~75% of physical per-core VMEM (do NOT blanket-request 64 MiB).
    out_isz = jnp.dtype(out_dtype).itemsize
    weight_bytes = sum(int(w.size) * w.dtype.itemsize for w in (w1, w2, w3, w4))
    bias_bytes = sum(int(b.size) * b.dtype.itemsize for b in (b1, b2, b3, b4))
    act_bytes = 2 * TB * (3 * latent * 4 + Op * out_isz)
    inter_bytes = TB * (H1p + H2p + H3p) * (4 + 2)  # f32 MXU out + bf16 copy
    vmem_est = 2 * (weight_bytes + bias_bytes) + act_bytes + inter_bytes
    try:
        phys_vmem = int(pltpu.get_tpu_info().vmem_capacity_bytes)
    except Exception:
        phys_vmem = 64 * 1024 * 1024  # v7x per-TC size as conservative floor
    vmem_limit = int(min(max(vmem_est * 3 // 2, 8 * 1024 * 1024),
                         phys_vmem * 3 // 4))

    flops = 2 * batch * (latent * h1 + h1 * h2 + h2 * h3 + h3 * out_dim)
    transcendentals = batch * (latent +
                               (out_dim if final_activation == "sigmoid" else 0))
    bytes_accessed = (weight_bytes + bias_bytes
                      + 3 * batch * latent * 4 + batch * out_dim * out_isz)
    cost = pl.CostEstimate(flops=flops,
                           transcendentals=transcendentals,
                           bytes_accessed=bytes_accessed)

    kernel = functools.partial(_decoder_kernel,
                               final_activation=final_activation)

    out_p = pl.pallas_call(
        kernel,
        out_shape=jax.ShapeDtypeStruct((Bp, Op), out_dtype),
        grid=grid,
        in_specs=in_specs,
        out_specs=out_specs,
        compiler_params=pltpu.CompilerParams(
            dimension_semantics=("parallel",),
            vmem_limit_bytes=vmem_limit),
        cost_estimate=cost,
    )(mu_p, lv_p, eps_p, w1, b1, w2, b2, w3, b3, w4, b4)

    # Drop batch / lane padding before returning.
    return out_p[:batch, :out_dim]


def init_decoder_params(key, latent_dim, hidden1, hidden2, hidden3, output_dim):
    """Deterministic synthetic parameter init (PyTorch-style uniform fan-in)."""
    dims = [(latent_dim, hidden1), (hidden1, hidden2),
            (hidden2, hidden3), (hidden3, output_dim)]
    params = {}
    for i, (fan_in, fan_out) in enumerate(dims, start=1):
        key, kw, kb = jax.random.split(key, 3)
        bound = 1.0 / jnp.sqrt(float(fan_in))
        params[f"w{i}"] = jax.random.uniform(
            kw, (fan_in, fan_out), jnp.float32, minval=-bound, maxval=bound)
        params[f"b{i}"] = jax.random.uniform(
            kb, (1, fan_out), jnp.float32, minval=-bound, maxval=bound)
    return params


if __name__ == "__main__":
    # Small shapes consistent with the module (hidden dims are the defaults).
    batch = 8
    latent_dim = 16
    hidden1, hidden2, hidden3 = 256, 512, 1024
    output_dim = 64

    key = jax.random.PRNGKey(0)
    k_mu, k_lv, k_eps, k_params = jax.random.split(key, 4)

    mu = jax.random.normal(k_mu, (batch, latent_dim), jnp.float32)
    logvar = jax.random.normal(k_lv, (batch, latent_dim), jnp.float32) * 0.1
    eps = jax.random.normal(k_eps, (batch, latent_dim), jnp.float32)

    params = init_decoder_params(k_params, latent_dim, hidden1, hidden2,
                                 hidden3, output_dim)
    # Pad + cast weights exactly once (hoisted out of the forward path).
    prepared = prepare_decoder_params(params)

    out = decoder_forward(mu, logvar, eps, prepared,
                          final_activation="sigmoid")
    out = jax.block_until_ready(out)
    assert out.shape == (batch, output_dim)

    # Full-precision reference (module semantics); tolerance covers the bf16
    # weight/activation path on the MXU and the approximate reciprocal.
    z = mu + eps * jnp.exp(logvar / 2.0)
    h = jnp.maximum(z @ params["w1"] + params["b1"], 0.0)
    h = jnp.maximum(h @ params["w2"] + params["b2"], 0.0)
    h = jnp.maximum(h @ params["w3"] + params["b3"], 0.0)
    ref = jax.nn.sigmoid(h @ params["w4"] + params["b4"])
    assert jnp.allclose(out, ref, atol=2e-2, rtol=2e-2), float(
        jnp.max(jnp.abs(out - ref)))

    print("KERNEL_OK")
</pallas_src>

<mosaic_0001>
module attributes {stable_mosaic.version = 11 : i64} {
  func.func @_decoder_kernel(%arg0: i32, %arg1: memref<8x16xf32, #tpu.memory_space<vmem>>, %arg2: memref<8x16xf32, #tpu.memory_space<vmem>>, %arg3: memref<8x16xf32, #tpu.memory_space<vmem>>, %arg4: memref<16x256xbf16, #tpu.memory_space<vmem>>, %arg5: memref<1x256xf32, #tpu.memory_space<vmem>>, %arg6: memref<256x512xbf16, #tpu.memory_space<vmem>>, %arg7: memref<1x512xf32, #tpu.memory_space<vmem>>, %arg8: memref<512x1024xbf16, #tpu.memory_space<vmem>>, %arg9: memref<1x1024xf32, #tpu.memory_space<vmem>>, %arg10: memref<1024x128xbf16, #tpu.memory_space<vmem>>, %arg11: memref<1x128xf32, #tpu.memory_space<vmem>>, %arg12: memref<8x128xf32, #tpu.memory_space<vmem>>) attributes {dimension_semantics = [#tpu.dimension_semantics<parallel>], iteration_bounds = array<i64: 1>, scalar_prefetch = 0 : i64, scratch_operands = 0 : i64, tpu.core_type = #tpu.core_type<tc>, window_params = [{transform_indices = @transform_0, window_bounds = array<i64: 8, 16>}, {transform_indices = @transform_1, window_bounds = array<i64: 8, 16>}, {transform_indices = @transform_2, window_bounds = array<i64: 8, 16>}, {pipeline_mode = #tpu.pipeline_mode<synchronous>, transform_indices = @transform_3, window_bounds = array<i64: 16, 256>}, {pipeline_mode = #tpu.pipeline_mode<synchronous>, transform_indices = @transform_4, window_bounds = array<i64: 1, 256>}, {pipeline_mode = #tpu.pipeline_mode<synchronous>, transform_indices = @transform_5, window_bounds = array<i64: 256, 512>}, {pipeline_mode = #tpu.pipeline_mode<synchronous>, transform_indices = @transform_6, window_bounds = array<i64: 1, 512>}, {pipeline_mode = #tpu.pipeline_mode<synchronous>, transform_indices = @transform_7, window_bounds = array<i64: 512, 1024>}, {pipeline_mode = #tpu.pipeline_mode<synchronous>, transform_indices = @transform_8, window_bounds = array<i64: 1, 1024>}, {pipeline_mode = #tpu.pipeline_mode<synchronous>, transform_indices = @transform_9, window_bounds = array<i64: 1024, 128>}, {pipeline_mode = #tpu.pipeline_mode<synchronous>, transform_indices = @transform_10, window_bounds = array<i64: 1, 128>}, {transform_indices = @transform_11, window_bounds = array<i64: 8, 128>}]} {
    %c0 = arith.constant 0 : index
    %c0_0 = arith.constant 0 : index
    %0 = vector.load %arg1[%c0, %c0_0] : memref<8x16xf32, #tpu.memory_space<vmem>>, vector<8x16xf32>
    %c0_1 = arith.constant 0 : index
    %c0_2 = arith.constant 0 : index
    %1 = vector.load %arg3[%c0_1, %c0_2] : memref<8x16xf32, #tpu.memory_space<vmem>>, vector<8x16xf32>
    %c0_3 = arith.constant 0 : index
    %c0_4 = arith.constant 0 : index
    %2 = vector.load %arg2[%c0_3, %c0_4] : memref<8x16xf32, #tpu.memory_space<vmem>>, vector<8x16xf32>
    %cst = arith.constant 5.000000e-01 : f32
    %3 = vector.broadcast %cst : f32 to vector<8x16xf32>
    %4 = arith.mulf %2, %3 : vector<8x16xf32>
    %5 = math.exp %4 : vector<8x16xf32>
    %6 = arith.mulf %1, %5 : vector<8x16xf32>
    %7 = arith.addf %0, %6 : vector<8x16xf32>
    %8 = arith.truncf %7 : vector<8x16xf32> to vector<8x16xbf16>
    %c0_5 = arith.constant 0 : index
    %c0_6 = arith.constant 0 : index
    %9 = vector.load %arg4[%c0_5, %c0_6] : memref<16x256xbf16, #tpu.memory_space<vmem>>, vector<16x256xbf16>
    %cst_7 = arith.constant dense<0.000000e+00> : vector<8x256xf32>
    %10 = tpu.matmul %8, %9, %cst_7 {dimension_numbers = #tpu.dot_dimension_numbers<[1], [0], [0], [1], [0, 0, 1, 1], [], []>} : vector<8x16xbf16>, vector<16x256xbf16>, vector<8x256xf32> -> vector<8x256xf32>
    %c0_8 = arith.constant 0 : index
    %c0_9 = arith.constant 0 : index
    %11 = vector.load %arg5[%c0_8, %c0_9] : memref<1x256xf32, #tpu.memory_space<vmem>>, vector<1x256xf32>
    %12 = vector.broadcast %11 : vector<1x256xf32> to vector<8x256xf32>
    %13 = arith.addf %10, %12 : vector<8x256xf32>
    %14 = arith.truncf %13 : vector<8x256xf32> to vector<8x256xbf16>
    %cst_10 = arith.constant 0.000000e+00 : bf16
    %15 = vector.broadcast %cst_10 : bf16 to vector<8x256xbf16>
    %16 = arith.maximumf %14, %15 : vector<8x256xbf16>
    %c0_11 = arith.constant 0 : index
    %c0_12 = arith.constant 0 : index
    %17 = vector.load %arg6[%c0_11, %c0_12] : memref<256x512xbf16, #tpu.memory_space<vmem>>, vector<256x512xbf16>
    %cst_13 = arith.constant dense<0.000000e+00> : vector<8x512xf32>
    %18 = tpu.matmul %16, %17, %cst_13 {dimension_numbers = #tpu.dot_dimension_numbers<[1], [0], [0], [1], [0, 0, 1, 1], [], []>} : vector<8x256xbf16>, vector<256x512xbf16>, vector<8x512xf32> -> vector<8x512xf32>
    %c0_14 = arith.constant 0 : index
    %c0_15 = arith.constant 0 : index
    %19 = vector.load %arg7[%c0_14, %c0_15] : memref<1x512xf32, #tpu.memory_space<vmem>>, vector<1x512xf32>
    %20 = vector.broadcast %19 : vector<1x512xf32> to vector<8x512xf32>
    %21 = arith.addf %18, %20 : vector<8x512xf32>
    %22 = arith.truncf %21 : vector<8x512xf32> to vector<8x512xbf16>
    %cst_16 = arith.constant 0.000000e+00 : bf16
    %23 = vector.broadcast %cst_16 : bf16 to vector<8x512xbf16>
    %24 = arith.maximumf %22, %23 : vector<8x512xbf16>
    %c0_17 = arith.constant 0 : index
    %c0_18 = arith.constant 0 : index
    %25 = vector.load %arg8[%c0_17, %c0_18] : memref<512x1024xbf16, #tpu.memory_space<vmem>>, vector<512x1024xbf16>
    %cst_19 = arith.constant dense<0.000000e+00> : vector<8x1024xf32>
    %26 = tpu.matmul %24, %25, %cst_19 {dimension_numbers = #tpu.dot_dimension_numbers<[1], [0], [0], [1], [0, 0, 1, 1], [], []>} : vector<8x512xbf16>, vector<512x1024xbf16>, vector<8x1024xf32> -> vector<8x1024xf32>
    %c0_20 = arith.constant 0 : index
    %c0_21 = arith.constant 0 : index
    %27 = vector.load %arg9[%c0_20, %c0_21] : memref<1x1024xf32, #tpu.memory_space<vmem>>, vector<1x1024xf32>
    %28 = vector.broadcast %27 : vector<1x1024xf32> to vector<8x1024xf32>
    %29 = arith.addf %26, %28 : vector<8x1024xf32>
    %30 = arith.truncf %29 : vector<8x1024xf32> to vector<8x1024xbf16>
    %cst_22 = arith.constant 0.000000e+00 : bf16
    %31 = vector.broadcast %cst_22 : bf16 to vector<8x1024xbf16>
    %32 = arith.maximumf %30, %31 : vector<8x1024xbf16>
    %c0_23 = arith.constant 0 : index
    %c0_24 = arith.constant 0 : index
    %33 = vector.load %arg10[%c0_23, %c0_24] : memref<1024x128xbf16, #tpu.memory_space<vmem>>, vector<1024x128xbf16>
    %cst_25 = arith.constant dense<0.000000e+00> : vector<8x128xf32>
    %34 = tpu.matmul %32, %33, %cst_25 {dimension_numbers = #tpu.dot_dimension_numbers<[1], [0], [0], [1], [0, 0, 1, 1], [], []>} : vector<8x1024xbf16>, vector<1024x128xbf16>, vector<8x128xf32> -> vector<8x128xf32>
    %c0_26 = arith.constant 0 : index
    %c0_27 = arith.constant 0 : index
    %35 = vector.load %arg11[%c0_26, %c0_27] : memref<1x128xf32, #tpu.memory_space<vmem>>, vector<1x128xf32>
    %36 = vector.broadcast %35 : vector<1x128xf32> to vector<8x128xf32>
    %37 = arith.addf %34, %36 : vector<8x128xf32>
    %cst_28 = arith.constant 0.000000e+00 : f32
    %38 = vector.broadcast %cst_28 : f32 to vector<8x128xf32>
    %39 = arith.subf %38, %37 : vector<8x128xf32>
    %40 = math.exp %39 : vector<8x128xf32>
    %cst_29 = arith.constant 1.000000e+00 : f32
    %41 = vector.broadcast %cst_29 : f32 to vector<8x128xf32>
    %42 = arith.addf %41, %40 : vector<8x128xf32>
    %43 = tpu.reciprocal %42 {approx = true} : vector<8x128xf32> -> vector<8x128xf32>
    %c0_30 = arith.constant 0 : index
    %c0_31 = arith.constant 0 : index
    %44 = vector.load %arg12[%c0_30, %c0_31] : memref<8x128xf32, #tpu.memory_space<vmem>>, vector<8x128xf32>
    tpu.vector_store %arg12[%c0_30, %c0_31], %43 {strides = array<i32>} : memref<8x128xf32, #tpu.memory_space<vmem>>, vector<8x128xf32>,
    return
  }
  func.func @transform_0(%arg0: i32) -> (i32, i32) {
    %c0_i32 = arith.constant 0 : i32
    %c0_i32_0 = arith.constant 0 : i32
    return %arg0, %c0_i32 : i32, i32
  }
  func.func @transform_1(%arg0: i32) -> (i32, i32) {
    %c0_i32 = arith.constant 0 : i32
    %c0_i32_0 = arith.constant 0 : i32
    return %arg0, %c0_i32 : i32, i32
  }
  func.func @transform_2(%arg0: i32) -> (i32, i32) {
    %c0_i32 = arith.constant 0 : i32
    %c0_i32_0 = arith.constant 0 : i32
    return %arg0, %c0_i32 : i32, i32
  }
  func.func @transform_3(%arg0: i32) -> (i32, i32) {
    %c0_i32 = arith.constant 0 : i32
    %c0_i32_0 = arith.constant 0 : i32
    %c0_i32_1 = arith.constant 0 : i32
    return %c0_i32, %c0_i32_0 : i32, i32
  }
  func.func @transform_4(%arg0: i32) -> (i32, i32) {
    %c0_i32 = arith.constant 0 : i32
    %c0_i32_0 = arith.constant 0 : i32
    %c0_i32_1 = arith.constant 0 : i32
    return %c0_i32, %c0_i32_0 : i32, i32
  }
  func.func @transform_5(%arg0: i32) -> (i32, i32) {
    %c0_i32 = arith.constant 0 : i32
    %c0_i32_0 = arith.constant 0 : i32
    %c0_i32_1 = arith.constant 0 : i32
    return %c0_i32, %c0_i32_0 : i32, i32
  }
  func.func @transform_6(%arg0: i32) -> (i32, i32) {
    %c0_i32 = arith.constant 0 : i32
    %c0_i32_0 = arith.constant 0 : i32
    %c0_i32_1 = arith.constant 0 : i32
    return %c0_i32, %c0_i32_0 : i32, i32
  }
  func.func @transform_7(%arg0: i32) -> (i32, i32) {
    %c0_i32 = arith.constant 0 : i32
    %c0_i32_0 = arith.constant 0 : i32
    %c0_i32_1 = arith.constant 0 : i32
    return %c0_i32, %c0_i32_0 : i32, i32
  }
  func.func @transform_8(%arg0: i32) -> (i32, i32) {
    %c0_i32 = arith.constant 0 : i32
    %c0_i32_0 = arith.constant 0 : i32
    %c0_i32_1 = arith.constant 0 : i32
    return %c0_i32, %c0_i32_0 : i32, i32
  }
  func.func @transform_9(%arg0: i32) -> (i32, i32) {
    %c0_i32 = arith.constant 0 : i32
    %c0_i32_0 = arith.constant 0 : i32
    %c0_i32_1 = arith.constant 0 : i32
    return %c0_i32, %c0_i32_0 : i32, i32
  }
  func.func @transform_10(%arg0: i32) -> (i32, i32) {
    %c0_i32 = arith.constant 0 : i32
    %c0_i32_0 = arith.constant 0 : i32
    %c0_i32_1 = arith.constant 0 : i32
    return %c0_i32, %c0_i32_0 : i32, i32
  }
  func.func @transform_11(%arg0: i32) -> (i32, i32) {
    %c0_i32 = arith.constant 0 : i32
    %c0_i32_0 = arith.constant 0 : i32
    return %arg0, %c0_i32 : i32, i32
  }
}

</mosaic_0001>

<bundles_post_ra>
// kernel: tpu_custom_call.1
= control target key start
LH: loop header
LB: loop body
LE: loop exit
PB: predicated region body
PF: predicated region fallthrough
CT: control target
= control target key end

     0   :  { %16 = vsyncpa [#allocation3], 0  ;;  %s5811_s0 = inlined_call_operand.hbm [shape: f32[8,16], index: 0, kind: input, shape index: {}]   ;;  %s5812_s1 = inlined_call_operand.hbm [shape: f32[8,16], index: 1, kind: input, shape index: {}]   ;;  %s5813_s2 = inlined_call_operand.hbm [shape: f32[8,16], index: 2, kind: input, shape index: {}]   ;;  %s5814_s3 = inlined_call_operand.hbm [shape: bf16[16,256], index: 3, kind: input, shape index: {}]   ;;  %s5815_s4 = inlined_call_operand.hbm [shape: f32[1,256], index: 4, kind: input, shape index: {}]   ;;  %s5816_s5 = inlined_call_operand.hbm [shape: bf16[256,512], index: 5, kind: input, shape index: {}]   ;;  %s5817_s6 = inlined_call_operand.vmem [shape: f32[1,512], index: 6, kind: input, shape index: {}]   ;;  %s5818_s7 = inlined_call_operand.hbm [shape: bf16[512,1024], index: 7, kind: input, shape index: {}]   ;;  %s5819_s8 = inlined_call_operand.hbm [shape: f32[1,1024], index: 8, kind: input, shape index: {}]   ;;  %s5820_s9 = inlined_call_operand.hbm [shape: bf16[1024,128], index: 9, kind: input, shape index: {}]   ;;  %s5821_s10 = inlined_call_operand.vmem [shape: f32[1,128], index: 10, kind: input, shape index: {}]   ;;  %s5822_s11 = inlined_call_operand.hbm [shape: f32[8,128], index: 11, kind: output, shape index: {}]  }
   0x1   :  { %17 = vsyncpa [#allocation6], 0 }
   0x2   :  { %18 = vsyncpa [#allocation9], 0 }
   0x3   :  { %19 = vsyncpa [#allocation12], 0 }
   0x4   :  { %20 = vsyncpa [#allocation15], 0  ;;  %s38_s19 = sshll.u32 %s5812_s1, 4  ;;  %s39_s19 = int_to_ptr.hbm [resolvable:$true] %s38_s19 }
   0x5   :  { %21 = vsyncpa [#allocation4], 0  ;;  %s5600_s20 = smov [#allocation5]   ;;  %s59_s24 = sshll.u32 %s5814_s3, 4  ;;  %s60_s24 = int_to_ptr.hbm [resolvable:$true] %s59_s24 }
   0x6   :  { %s40_s21 = sshll.u32 %s5600_s20, 4  ;;  %s5601_s25 = smov [#allocation8]   ;;  %s41_s21 = int_to_ptr.vmem [resolvable:$true] %s40_s21 }
   0x7   :  { %43 = dma.hbm_to_vmem [thread:$0]  %s39_s19, 128, %s41_s21, [#allocation6]  }
   0x8   :  { %s61_s26 = sshll.u32 %s5601_s25, 4  ;;  %s5602_s27 = smov 128   ;;  %s62_s26 = int_to_ptr.vmem [resolvable:$true] %s61_s26 }
   0x9   :  { %s5603_s28 = smov 8   ;;  %s83_s1 = sshll.u32 %s5816_s5, 4  ;;  %s84_s1 = int_to_ptr.hbm [resolvable:$true] %s83_s1 }
   0xa   :  { %67 = dma.hbm_to_vmem [thread:$0]  %s60_s24, 256, %s62_s26, [#allocation9], %s5602_s27, %s5602_s27, %s5603_s28  }
   0xb   :  { %s5604_s12 = smov [#allocation11]   ;;  %s112_s3 = sshll.u32 %s5819_s8, 4  ;;  %s113_s3 = int_to_ptr.hbm [resolvable:$true] %s112_s3 }
   0xc   :  { %s85_s13 = sshll.u32 %s5604_s12, 4  ;;  %s5605_s16 = smov 256   ;;  %s86_s13 = int_to_ptr.vmem [resolvable:$true] %s85_s13 }
   0xd   :  { %s5606_s17 = smov 16   ;;  %s5607_s18 = smov [#allocation14]  }
   0xe   :  { %91 = dma.hbm_to_vmem [thread:$0]  %s84_s1, 8192, %s86_s13, [#allocation12], %s5605_s16, %s5605_s16, %s5606_s17  }
   0xf   :  { %s114_s19 = sshll.u32 %s5607_s18, 4  ;;  %s27_s22 = sshll.u32 %s5811_s0, 4  ;;  %s115_s19 = int_to_ptr.vmem [resolvable:$true] %s114_s19  ;;  %s28_s22 = int_to_ptr.hbm [resolvable:$true] %s27_s22 }
  0x10   :  { %117 = dma.hbm_to_vmem [thread:$0]  %s113_s3, 128, %s115_s19, [#allocation15]  }
  0x11   :  { %s49_s24 = sshll.u32 %s5813_s2, 4  ;;  %s5608_s25 = smov [#allocation2]   ;;  %s50_s24 = int_to_ptr.hbm [resolvable:$true] %s49_s24 }
  0x12   :  { %s29_s26 = sshll.u32 %s5608_s25, 4  ;;  %s5609_s8 = smov [#allocation7]   ;;  %s30_s26 = int_to_ptr.vmem [resolvable:$true] %s29_s26 }
  0x13   :  { %32 = dma.hbm_to_vmem [thread:$0]  %s28_s22, 128, %s30_s26, [#allocation3]  }
  0x14   :  { %s51_s27 = sshll.u32 %s5609_s8, 4  ;;  %s73_s30 = sshll.u32 %s5815_s4, 4  ;;  %s52_s27 = int_to_ptr.vmem [resolvable:$true] %s51_s27  ;;  %s74_s30 = int_to_ptr.hbm [resolvable:$true] %s73_s30 }
  0x15   :  { %54 = dma.hbm_to_vmem [thread:$0]  %s50_s24, 128, %s52_s27, [#allocation6]  }
  0x16   :  { %s98_s12 = sshll.u32 %s5818_s7, 4  ;;  %s5610_s13 = smov [#allocation10]   ;;  %s99_s12 = int_to_ptr.hbm [resolvable:$true] %s98_s12 }
  0x17   :  { %s75_s2 = sshll.u32 %s5610_s13, 4  ;;  %s5611_s14 = smov [#allocation13]   ;;  %s76_s2 = int_to_ptr.vmem [resolvable:$true] %s75_s2 }
  0x18   :  { %78 = dma.hbm_to_vmem [thread:$0]  %s74_s30, 32, %s76_s2, [#allocation9]  }
  0x19   :  { %s100_s15 = sshll.u32 %s5611_s14, 4  ;;  %s5612_s3 = smov 512   ;;  %s101_s15 = int_to_ptr.vmem [resolvable:$true] %s100_s15 }
  0x1a   :  { %s5613_s16 = smov 32   ;;  %s122_s18 = sshll.u32 %s5820_s9, 4  ;;  %s123_s18 = int_to_ptr.hbm [resolvable:$true] %s122_s18 }
  0x1b   :  { %106 = dma.hbm_to_vmem [thread:$0]  %s99_s12, 32768, %s101_s15, [#allocation12], %s5612_s3, %s5612_s3, %s5613_s16  }
  0x1c   :  { %s5614_s19 = smov [#allocation16]   ;;  %s5615_s7 = smov 64  }
  0x1d   :  { %s124_s20 = sshll.u32 %s5614_s19, 4  ;;  %s5616_s21 = smov 4   ;;  %s125_s20 = int_to_ptr.vmem [resolvable:$true] %s124_s20 }
  0x1e   :  { %130 = dma.hbm_to_vmem [thread:$0]  %s123_s18, 8192, %s125_s20, [#allocation15], %s5615_s7, %s5615_s7, %s5616_s21  }
  0x1f   :  { %5588 = dma.done.wait [#allocation3], 128  }
  0x20   :  { %5589 = vsyncadd [#allocation3], 4294967168 }
  0x21   :  { %5590 = dma.done.wait [#allocation6], 256  }
  0x22   :  { %5591 = vsyncadd [#allocation6], 4294967040 }
  0x23   :  { %5592 = dma.done.wait [#allocation9], 288  }
  0x24   :  { %5593 = vsyncadd [#allocation9], 4294967008 }
  0x25   :  { %5594 = dma.done.wait [#allocation12], 40960  }
  0x26   :  { %5595 = vsyncadd [#allocation12], 4294926336 }
  0x27   :  { %5596 = dma.done.wait [#allocation15], 8320  }
  0x28   :  { %5597 = vsyncadd [#allocation15], 4294958976  ;;  %v3393_v0 = vld [vmem:[#allocation8] sm:$0xf]  ;;  %v4938_v1 = vld [vmem:[#allocation8 + $0x4] sm:$0xf0] }
  0x29   :  { %v4937_v2 = vld [vmem:[#allocation8 + $0x4] sm:$0xf]  ;;  %v3394_v3 = vor.u32 %v4938_v1, %v3393_v0  ;;  %v3395_v4 = vld [vmem:[#allocation8 + $0x8] sm:$0xf0]  ;;  %v172_v6 = vld [vmem:[#allocation5] sm:$0xff]  ;;  %vm197_vm0 = vcmask 130048  }
  0x2a   :  { %v3398_v5 = vor.u32 %v4937_v2, %v3395_v4  ;;  %v3515_v7 = vld [vmem:[#allocation11 + $0xe0] sm:$0xf]  ;;  %v4969_v8 = vld [vmem:[#allocation11 + $0xec] sm:$0xf0]  ;;  %v173_v9 = vmul.f32 0.5, %v172_v6  ;;  %v171_v34 = vld [vmem:[#allocation7] sm:$0xff] }
  0x2b   :  { %208 = vmatpush.bf16.msra.mxu0 %v3394_v3  ;;  %v3516_v10 = vor.u32 %v4969_v8, %v3515_v7  ;;  %v3643_v11 = vld [vmem:[#allocation11 + $0x1e0] sm:$0xf]  ;;  %v5001_v12 = vld [vmem:[#allocation11 + $0x1ec] sm:$0xf0]  ;;  %v4967_v14 = vld [vmem:[#allocation11 + $0xe4] sm:$0xf] }
  0x2c   :  { %221 = vmatpush.bf16.msra.mxu1 %v3398_v5  ;;  %v3644_v13 = vor.u32 %v5001_v12, %v3643_v11  ;;  %v3517_v15 = vld [vmem:[#allocation11 + $0xf0] sm:$0xf0]  ;;  %v4999_v16 = vld [vmem:[#allocation11 + $0x1e4] sm:$0xf]  ;;  %v174_v17 = vmul.f32 1.442695, %v173_v9 }
  0x2d   :  { %628 = vmatpush.bf16.msra.mxu2 %v3516_v10  ;;  %v3520_v18 = vor.u32 %v4967_v14, %v3517_v15  ;;  %v3645_v19 = vld [vmem:[#allocation11 + $0x1f0] sm:$0xf0]  ;;  %v3499_v20 = vld [vmem:[#allocation11 + $0xc0] sm:$0xf]  ;;  %v4965_v22 = vld [vmem:[#allocation11 + $0xcc] sm:$0xf0] }
  0x2e   :  { %641 = vmatpush.bf16.msra.mxu3 %v3644_v13  ;;  %v3648_v21 = vor.u32 %v4999_v16, %v3645_v19  ;;  %v3627_v23 = vld [vmem:[#allocation11 + $0x1c0] sm:$0xf]  ;;  %v4997_v24 = vld [vmem:[#allocation11 + $0x1cc] sm:$0xf0]  ;;  %5342 = vpow2.f32 %v174_v17  ;;  %v3500_v25 = vor.u32 %v4965_v22, %v3499_v20  ;;  %v4963_v27 = vld [vmem:[#allocation11 + $0xc4] sm:$0xf] }
  0x2f   :  { %654 = vmatpush.bf16.msrb.mxu0 %v3520_v18  ;;  %v3628_v26 = vor.u32 %v4997_v24, %v3627_v23  ;;  %v3501_v28 = vld [vmem:[#allocation11 + $0xd0] sm:$0xf0]  ;;  %v4995_v29 = vld [vmem:[#allocation11 + $0x1c4] sm:$0xf]  ;;  %v3483_v32 = vld [vmem:[#allocation11 + $0xa0] sm:$0xf] }
  0x30   :  { %667 = vmatpush.bf16.msrb.mxu1 %v3648_v21  ;;  %v3504_v30 = vor.u32 %v4963_v27, %v3501_v28  ;;  %v3629_v31 = vld [vmem:[#allocation11 + $0x1d0] sm:$0xf0]  ;;  %v4961_v33 = vld [vmem:[#allocation11 + $0xac] sm:$0xf0]  ;;  %v3611_v37 = vld [vmem:[#allocation11 + $0x1a0] sm:$0xf] }
  0x31   :  { %629 = vmatpush.bf16.msra.mxu2 %v3500_v25  ;;  %v3632_v35 = vor.u32 %v4995_v29, %v3629_v31  ;;  %v3484_v36 = vor.u32 %v4961_v33, %v3483_v32  ;;  %v4993_v38 = vld [vmem:[#allocation11 + $0x1ac] sm:$0xf0]  ;;  %v4959_v39 = vld [vmem:[#allocation11 + $0xa4] sm:$0xf]  ;;  %v3485_v41 = vld [vmem:[#allocation11 + $0xb0] sm:$0xf0] }
  0x32   :  { %642 = vmatpush.bf16.msra.mxu3 %v3628_v26  ;;  %v3612_v40 = vor.u32 %v4993_v38, %v3611_v37  ;;  %v4991_v42 = vld [vmem:[#allocation11 + $0x1a4] sm:$0xf]  ;;  %v3613_v43 = vld [vmem:[#allocation11 + $0x1b0] sm:$0xf0]  ;;  %v3488_v44 = vor.u32 %v4959_v39, %v3485_v41  ;;  %v3467_v45 = vld [vmem:[#allocation11 + $0x80] sm:$0xf] }
  0x33   :  { %655 = vmatpush.bf16.msrb.mxu0 %v3504_v30  ;;  %v4957_v46 = vld [vmem:[#allocation11 + $0x8c] sm:$0xf0]  ;;  %v3595_v47 = vld [vmem:[#allocation11 + $0x180] sm:$0xf]  ;;  %v3616_v48 = vor.u32 %v4991_v42, %v3613_v43  ;;  %v4955_v50 = vld [vmem:[#allocation11 + $0x84] sm:$0xf] }
  0x34   :  { %668 = vmatpush.bf16.msrb.mxu1 %v3632_v35  ;;  %v4989_v49 = vld [vmem:[#allocation11 + $0x18c] sm:$0xf0]  ;;  %v3469_v51 = vld [vmem:[#allocation11 + $0x90] sm:$0xf0]  ;;  %v5343_v52 = vpop.eup %5342  ;;  %v3468_v54 = vor.u32 %v4957_v46, %v3467_v45  ;;  %v4987_v55 = vld [vmem:[#allocation11 + $0x184] sm:$0xf] }
  0x35   :  { %v170_v53 = vld [vmem:[#allocation2] sm:$0xff]  ;;  %630 = vmatpush.bf16.msra.mxu2 %v3484_v36  ;;  %v176_v56 = vmul.f32 %v5343_v52, %v171_v34  ;;  %v3596_v57 = vor.u32 %v4989_v49, %v3595_v47  ;;  %v3451_v59 = vld [vmem:[#allocation11 + $0x60] sm:$0xf]  ;;  %v4953_v60 = vld [vmem:[#allocation11 + $0x6c] sm:$0xf0]  ;;  %v3472_v61 = vor.u32 %v4955_v50, %v3469_v51  ;;  %s3377_s26 = sshll.u32 %s5822_s11, 4  ;;  %s3378_s26 = int_to_ptr.hbm [resolvable:$true] %s3377_s26 }
  0x36   :  { %643 = vmatpush.bf16.msra.mxu3 %v3612_v40  ;;  %v3597_v58 = vld [vmem:[#allocation11 + $0x190] sm:$0xf0]  ;;  %v3579_v62 = vld [vmem:[#allocation11 + $0x160] sm:$0xf]  ;;  %v4985_v63 = vld [vmem:[#allocation11 + $0x16c] sm:$0xf0]  ;;  %v3452_v4 = vor.u32 %v4953_v60, %v3451_v59 }
  0x37   :  { %656 = vmatpush.bf16.msrb.mxu0 %v3488_v44  ;;  %v177_v0 = vadd.f32 %v176_v56, %v170_v53  ;;  %v4951_v1 = vld [vmem:[#allocation11 + $0x64] sm:$0xf]  ;;  %v3453_v2 = vld [vmem:[#allocation11 + $0x70] sm:$0xf0]  ;;  %v3600_v3 = vor.u32 %v4987_v55, %v3597_v58  ;;  %v3580_v7 = vor.u32 %v4985_v63, %v3579_v62  ;;  %v3435_v9 = vld [vmem:[#allocation11 + $0x40] sm:$0xf] }
  0x38   :  { %669 = vmatpush.bf16.msrb.mxu1 %v3616_v48  ;;  %v4983_v5 = vld [vmem:[#allocation11 + $0x164] sm:$0xf]  ;;  %v3581_v8 = vld [vmem:[#allocation11 + $0x170] sm:$0xf0]  ;;  %v4949_v10 = vld [vmem:[#allocation11 + $0x4c] sm:$0xf0]  ;;  %v3456_v11 = vor.u32 %v4951_v1, %v3453_v2 }
  0x39   :  { %631 = vmatpush.bf16.msra.mxu2 %v3468_v54  ;;  %v178_v6 = vpack.c.bf16 %v177_v0, %v177_v0  ;;  %v3563_v12 = vld [vmem:[#allocation11 + $0x140] sm:$0xf]  ;;  %v4981_v13 = vld [vmem:[#allocation11 + $0x14c] sm:$0xf0]  ;;  %v4947_v14 = vld [vmem:[#allocation11 + $0x44] sm:$0xf]  ;;  %v3584_v16 = vor.u32 %v4983_v5, %v3581_v8  ;;  %v3436_v17 = vor.u32 %v4949_v10, %v3435_v9 }
  0x3a   :  { %644 = vmatpush.bf16.msra.mxu3 %v3596_v57  ;;  %v3437_v15 = vld [vmem:[#allocation11 + $0x50] sm:$0xf0]  ;;  %v4979_v18 = vld [vmem:[#allocation11 + $0x144] sm:$0xf]  ;;  %v3564_v19 = vor.u32 %v4981_v13, %v3563_v12  ;;  %v3419_v21 = vld [vmem:[#allocation11 + $0x20] sm:$0xf] }
  0x3b   :  { %657 = vmatpush.bf16.msrb.mxu0 %v3472_v61  ;;  %3400 = vmatmul.msk.bf16.vlgmr.msra.gmra.mxu1 %vm197_vm0, %v178_v6  ;;  %v3565_v20 = vld [vmem:[#allocation11 + $0x150] sm:$0xf0]  ;;  %v4945_v22 = vld [vmem:[#allocation11 + $0x2c] sm:$0xf0]  ;;  %v3440_v23 = vor.u32 %v4947_v14, %v3437_v15  ;;  %v3547_v24 = vld [vmem:[#allocation11 + $0x120] sm:$0xf] }
  0x3c   :  { %3399 = vmatmul.msk.bf16.vlgmr.msra.gmra.mxu0 %vm197_vm0, %v178_v6  ;;  %670 = vmatpush.bf16.msrb.mxu1 %v3600_v3  ;;  %v4977_v25 = vld [vmem:[#allocation11 + $0x12c] sm:$0xf0]  ;;  %v4943_v26 = vld [vmem:[#allocation11 + $0x24] sm:$0xf]  ;;  %v3421_v27 = vld [vmem:[#allocation11 + $0x30] sm:$0xf0]  ;;  %v3568_v28 = vor.u32 %v4979_v18, %v3565_v20  ;;  %v3420_v29 = vor.u32 %v4945_v22, %v3419_v21 }
  0x3d   :  { %632 = vmatpush.bf16.msra.mxu2 %v3452_v4  ;;  %v4975_v30 = vld [vmem:[#allocation11 + $0x124] sm:$0xf]  ;;  %v3549_v31 = vld [vmem:[#allocation11 + $0x130] sm:$0xf0]  ;;  %v3403_v32 = vld [vmem:[#allocation11] sm:$0xf]  ;;  %v3548_v33 = vor.u32 %v4977_v25, %v3547_v24  ;;  %v3424_v37 = vor.u32 %v4943_v26, %v3421_v27 }
  0x3e   :  { %645 = vmatpush.bf16.msra.mxu3 %v3580_v7  ;;  %v4941_v34 = vld [vmem:[#allocation11 + $0xc] sm:$0xf0]  ;;  %v3531_v35 = vld [vmem:[#allocation11 + $0x100] sm:$0xf]  ;;  %v4939_v38 = vld [vmem:[#allocation11 + $0x4] sm:$0xf]  ;;  %v3552_v44 = vor.u32 %v4975_v30, %v3549_v31 }
  0x3f   :  { %658 = vmatpush.bf16.msrb.mxu0 %v3456_v11  ;;  %v4973_v36 = vld [vmem:[#allocation11 + $0x10c] sm:$0xf0]  ;;  %v3523_v39 = vld [vmem:[#allocation11 + $0xe8] sm:$0xf]  ;;  %v4970_v40 = vld [vmem:[#allocation11 + $0xf4] sm:$0xf0]  ;;  %v3404_v45 = vor.u32 %v4941_v34, %v3403_v32 }
  0x40   :  { %671 = vmatpush.bf16.msrb.mxu1 %v3584_v16  ;;  %v3405_v41 = vld [vmem:[#allocation11 + $0x10] sm:$0xf0]  ;;  %v3651_v42 = vld [vmem:[#allocation11 + $0x1e8] sm:$0xf]  ;;  %v5002_v43 = vld [vmem:[#allocation11 + $0x1f4] sm:$0xf0]  ;;  %v3532_v49 = vor.u32 %v4973_v36, %v3531_v35  ;;  %v3524_v51 = vor.u32 %v4970_v40, %v3523_v39 }
  0x41   :  { %633 = vmatpush.bf16.msra.mxu2 %v3436_v17  ;;  %v4971_v46 = vld [vmem:[#allocation11 + $0x104] sm:$0xf]  ;;  %v4968_v47 = vld [vmem:[#allocation11 + $0xec] sm:$0xf]  ;;  %v3525_v48 = vld [vmem:[#allocation11 + $0xf8] sm:$0xf0]  ;;  %v3408_v53 = vor.u32 %v4939_v38, %v3405_v41  ;;  %v3652_v54 = vor.u32 %v5002_v43, %v3651_v42 }
  0x42   :  { %646 = vmatpush.bf16.msra.mxu3 %v3564_v19  ;;  %v3533_v50 = vld [vmem:[#allocation11 + $0x110] sm:$0xf0]  ;;  %v5000_v52 = vld [vmem:[#allocation11 + $0x1ec] sm:$0xf]  ;;  %v3653_v55 = vld [vmem:[#allocation11 + $0x1f8] sm:$0xf0]  ;;  %v3528_v58 = vor.u32 %v4968_v47, %v3525_v48 }
  0x43   :  { %659 = vmatpush.bf16.msrb.mxu0 %v3440_v23  ;;  %v3507_v56 = vld [vmem:[#allocation11 + $0xc8] sm:$0xf]  ;;  %v4966_v57 = vld [vmem:[#allocation11 + $0xd4] sm:$0xf0]  ;;  %v3536_v61 = vor.u32 %v4971_v46, %v3533_v50  ;;  %v4964_v62 = vld [vmem:[#allocation11 + $0xcc] sm:$0xf]  ;;  %v3656_v0 = vor.u32 %v5000_v52, %v3653_v55 }
  0x44   :  { %672 = vmatpush.bf16.msrb.mxu1 %v3568_v28  ;;  %v3635_v59 = vld [vmem:[#allocation11 + $0x1c8] sm:$0xf]  ;;  %v4998_v60 = vld [vmem:[#allocation11 + $0x1d4] sm:$0xf0]  ;;  %v3509_v63 = vld [vmem:[#allocation11 + $0xd8] sm:$0xf0]  ;;  %v3508_v1 = vor.u32 %v4966_v57, %v3507_v56 }
  0x45   :  { %634 = vmatpush.bf16.msra.mxu2 %v3420_v29  ;;  %v3636_v2 = vor.u32 %v4998_v60, %v3635_v59  ;;  %v4996_v3 = vld [vmem:[#allocation11 + $0x1cc] sm:$0xf]  ;;  %v3637_v4 = vld [vmem:[#allocation11 + $0x1d8] sm:$0xf0]  ;;  %v3512_v5 = vor.u32 %v4964_v62, %v3509_v63  ;;  %v3491_v7 = vld [vmem:[#allocation11 + $0xa8] sm:$0xf] }
  0x46   :  { %647 = vmatpush.bf16.msra.mxu3 %v3548_v33  ;;  %v3640_v6 = vor.u32 %v4996_v3, %v3637_v4  ;;  %v4962_v8 = vld [vmem:[#allocation11 + $0xb4] sm:$0xf0]  ;;  %v3619_v9 = vld [vmem:[#allocation11 + $0x1a8] sm:$0xf]  ;;  %v4960_v12 = vld [vmem:[#allocation11 + $0xac] sm:$0xf] }
  0x47   :  { %660 = vmatpush.bf16.msrb.mxu0 %v3424_v37  ;;  %v3492_v10 = vor.u32 %v4962_v8, %v3491_v7  ;;  %v4994_v11 = vld [vmem:[#allocation11 + $0x1b4] sm:$0xf0]  ;;  %v3493_v13 = vld [vmem:[#allocation11 + $0xb8] sm:$0xf0]  ;;  %v4992_v16 = vld [vmem:[#allocation11 + $0x1ac] sm:$0xf] }
  0x48   :  { %673 = vmatpush.bf16.msrb.mxu1 %v3552_v44  ;;  %v3620_v14 = vor.u32 %v4994_v11, %v3619_v9  ;;  %v3496_v15 = vor.u32 %v4960_v12, %v3493_v13  ;;  %v3621_v17 = vld [vmem:[#allocation11 + $0x1b8] sm:$0xf0]  ;;  %v3475_v19 = vld [vmem:[#allocation11 + $0x88] sm:$0xf]  ;;  %v4958_v20 = vld [vmem:[#allocation11 + $0x94] sm:$0xf0] }
  0x49   :  { %635 = vmatpush.bf16.msra.mxu2 %v3404_v45  ;;  %v3624_v18 = vor.u32 %v4992_v16, %v3621_v17  ;;  %v3603_v21 = vld [vmem:[#allocation11 + $0x188] sm:$0xf]  ;;  %v3476_v22 = vor.u32 %v4958_v20, %v3475_v19  ;;  %v4990_v23 = vld [vmem:[#allocation11 + $0x194] sm:$0xf0]  ;;  %v4956_v24 = vld [vmem:[#allocation11 + $0x8c] sm:$0xf] }
  0x4a   :  { %648 = vmatpush.bf16.msra.mxu3 %v3532_v49  ;;  %v3477_v25 = vld [vmem:[#allocation11 + $0x98] sm:$0xf0]  ;;  %v3604_v26 = vor.u32 %v4990_v23, %v3603_v21  ;;  %v4988_v28 = vld [vmem:[#allocation11 + $0x18c] sm:$0xf]  ;;  %v3459_v31 = vld [vmem:[#allocation11 + $0x68] sm:$0xf] }
  0x4b   :  { %661 = vmatpush.bf16.msrb.mxu0 %v3408_v53  ;;  %v3480_v27 = vor.u32 %v4956_v24, %v3477_v25  ;;  %v3605_v29 = vld [vmem:[#allocation11 + $0x198] sm:$0xf0]  ;;  %v4954_v32 = vld [vmem:[#allocation11 + $0x74] sm:$0xf0]  ;;  %v3587_v33 = vld [vmem:[#allocation11 + $0x168] sm:$0xf] }
  0x4c   :  { %674 = vmatpush.bf16.msrb.mxu1 %v3536_v61  ;;  %v3608_v30 = vor.u32 %v4988_v28, %v3605_v29  ;;  %v3460_v34 = vor.u32 %v4954_v32, %v3459_v31  ;;  %v4986_v35 = vld [vmem:[#allocation11 + $0x174] sm:$0xf0]  ;;  %v4952_v36 = vld [vmem:[#allocation11 + $0x6c] sm:$0xf]  ;;  %v3461_v37 = vld [vmem:[#allocation11 + $0x78] sm:$0xf0] }
  0x4d   :  { %680 = vmatpush.bf16.msrb.mxu2 %v3524_v51  ;;  %v3588_v38 = vor.u32 %v4986_v35, %v3587_v33  ;;  %v3464_v39 = vor.u32 %v4952_v36, %v3461_v37  ;;  %v4984_v40 = vld [vmem:[#allocation11 + $0x16c] sm:$0xf]  ;;  %v3589_v41 = vld [vmem:[#allocation11 + $0x178] sm:$0xf0]  ;;  %v3443_v42 = vld [vmem:[#allocation11 + $0x48] sm:$0xf] }
  0x4e   :  { %693 = vmatpush.bf16.msrb.mxu3 %v3652_v54  ;;  %v3592_v43 = vor.u32 %v4984_v40, %v3589_v41  ;;  %v4950_v44 = vld [vmem:[#allocation11 + $0x54] sm:$0xf0]  ;;  %v3571_v45 = vld [vmem:[#allocation11 + $0x148] sm:$0xf]  ;;  %v4948_v49 = vld [vmem:[#allocation11 + $0x4c] sm:$0xf] }
  0x4f   :  { %706 = vmatpush.bf16.msra.mxu0 %v3528_v58  ;;  %v4982_v46 = vld [vmem:[#allocation11 + $0x154] sm:$0xf0]  ;;  %v3444_v47 = vor.u32 %v4950_v44, %v3443_v42  ;;  %v3445_v50 = vld [vmem:[#allocation11 + $0x58] sm:$0xf0]  ;;  %v4980_v51 = vld [vmem:[#allocation11 + $0x14c] sm:$0xf] }
  0x50   :  { %719 = vmatpush.bf16.msra.mxu1 %v3656_v0  ;;  %v3572_v48 = vor.u32 %v4982_v46, %v3571_v45  ;;  %v3448_v52 = vor.u32 %v4948_v49, %v3445_v50  ;;  %v3573_v53 = vld [vmem:[#allocation11 + $0x158] sm:$0xf0]  ;;  %v3427_v54 = vld [vmem:[#allocation11 + $0x28] sm:$0xf]  ;;  %v4946_v55 = vld [vmem:[#allocation11 + $0x34] sm:$0xf0] }
  0x51   :  { %681 = vmatpush.bf16.msrb.mxu2 %v3508_v1  ;;  %v3576_v56 = vor.u32 %v4980_v51, %v3573_v53  ;;  %v3555_v57 = vld [vmem:[#allocation11 + $0x128] sm:$0xf]  ;;  %v4978_v58 = vld [vmem:[#allocation11 + $0x134] sm:$0xf0]  ;;  %v4944_v59 = vld [vmem:[#allocation11 + $0x2c] sm:$0xf]  ;;  %v3428_v60 = vor.u32 %v4946_v55, %v3427_v54 }
  0x52   :  { %694 = vmatpush.bf16.msrb.mxu3 %v3636_v2  ;;  %v3429_v61 = vld [vmem:[#allocation11 + $0x38] sm:$0xf0]  ;;  %v4976_v62 = vld [vmem:[#allocation11 + $0x12c] sm:$0xf]  ;;  %v3556_v0 = vor.u32 %v4978_v58, %v3555_v57  ;;  %v3411_v2 = vld [vmem:[#allocation11 + $0x8] sm:$0xf] }
  0x53   :  { %707 = vmatpush.bf16.msra.mxu0 %v3512_v5  ;;  %v3557_v63 = vld [vmem:[#allocation11 + $0x138] sm:$0xf0]  ;;  %v3432_v1 = vor.u32 %v4944_v59, %v3429_v61  ;;  %v4942_v3 = vld [vmem:[#allocation11 + $0x14] sm:$0xf0]  ;;  %v3539_v4 = vld [vmem:[#allocation11 + $0x108] sm:$0xf] }
  0x54   :  { %720 = vmatpush.bf16.msra.mxu1 %v3640_v6  ;;  %v3560_v5 = vor.u32 %v4976_v62, %v3557_v63  ;;  %v4974_v6 = vld [vmem:[#allocation11 + $0x114] sm:$0xf0]  ;;  %v4940_v7 = vld [vmem:[#allocation11 + $0xc] sm:$0xf]  ;;  %v3413_v8 = vld [vmem:[#allocation11 + $0x18] sm:$0xf0]  ;;  %v3412_v11 = vor.u32 %v4942_v3, %v3411_v2 }
  0x55   :  { %682 = vmatpush.bf16.msrb.mxu2 %v3492_v10  ;;  %v4972_v9 = vld [vmem:[#allocation11 + $0x10c] sm:$0xf]  ;;  %v3541_v10 = vld [vmem:[#allocation11 + $0x118] sm:$0xf0]  ;;  %v3540_v12 = vor.u32 %v4974_v6, %v3539_v4  ;;  %v3416_v13 = vor.u32 %v4940_v7, %v3413_v8  ;;  %v5127_v23 = vld [vmem:[#allocation13 + $0x3dc] sm:$0xf0] }
  0x56   :  { %695 = vmatpush.bf16.msrb.mxu3 %v3620_v14  ;;  %v3544_v14 = vor.u32 %v4972_v9, %v3541_v10  ;;  %v3883_v24 = vld [vmem:[#allocation13 + $0x1c0] sm:$0xf] }
  0x57   :  { %708 = vmatpush.bf16.msra.mxu0 %v3496_v15  ;;  %v181_v15 = vld [vmem:[#allocation10] sm:$0x3]  ;;  %v5063_v25 = vld [vmem:[#allocation13 + $0x1dc] sm:$0xf0] }
  0x58   :  { %721 = vmatpush.bf16.msra.mxu1 %v3624_v18  ;;  %v183_v16 = vperm.slane %v181_v15, 0  ;;  %v184_v17 = vperm.slane %v181_v15, 1  ;;  %v5191_v31 = vld [vmem:[#allocation13 + $0x5dc] sm:$0xf0]  ;;  %v3884_v37 = vor.u32 %v5063_v25, %v3883_v24 }
  0x59   :  { %683 = vmatpush.bf16.msrb.mxu2 %v3476_v22  ;;  %v4139_v22 = vld [vmem:[#allocation13 + $0x3c0] sm:$0xf] }
  0x5a   :  { %696 = vmatpush.bf16.msrb.mxu3 %v3604_v26  ;;  %v4651_v26 = vld [vmem:[#allocation13 + $0x7c0] sm:$0xf] }
  0x5b   :  { %709 = vmatpush.bf16.msra.mxu0 %v3480_v27  ;;  %v5255_v27 = vld [vmem:[#allocation13 + $0x7dc] sm:$0xf0] }
  0x5c   :  { %722 = vmatpush.bf16.msra.mxu1 %v3608_v30  ;;  %v4395_v30 = vld [vmem:[#allocation13 + $0x5c0] sm:$0xf]  ;;  %v4652_v40 = vor.u32 %v5255_v27, %v4651_v26 }
  0x5d   :  { %684 = vmatpush.bf16.msrb.mxu2 %v3460_v34  ;;  %v4140_v34 = vor.u32 %v5127_v23, %v4139_v22  ;;  %v4107_v35 = vld [vmem:[#allocation13 + $0x380] sm:$0xf]  ;;  %v4396_v42 = vor.u32 %v5191_v31, %v4395_v30 }
  0x5e   :  { %697 = vmatpush.bf16.msrb.mxu3 %v3588_v38  ;;  %v5119_v36 = vld [vmem:[#allocation13 + $0x39c] sm:$0xf0] }
  0x5f   :  { %710 = vmatpush.bf16.msra.mxu0 %v3464_v39  ;;  %v3851_v38 = vld [vmem:[#allocation13 + $0x180] sm:$0xf] }
  0x60   :  { %723 = vmatpush.bf16.msra.mxu1 %v3592_v43  ;;  %v5055_v39 = vld [vmem:[#allocation13 + $0x19c] sm:$0xf0] }
  0x61   :  { %685 = vmatpush.bf16.msrb.mxu2 %v3444_v47  ;;  %v4619_v41 = vld [vmem:[#allocation13 + $0x780] sm:$0xf]  ;;  %v3852_v51 = vor.u32 %v5055_v39, %v3851_v38 }
  0x62   :  { %698 = vmatpush.bf16.msrb.mxu3 %v3572_v48  ;;  %v5247_v43 = vld [vmem:[#allocation13 + $0x79c] sm:$0xf0]  ;;  %v4108_v48 = vor.u32 %v5119_v36, %v4107_v35 }
  0x63   :  { %711 = vmatpush.bf16.msra.mxu0 %v3448_v52  ;;  %v4363_v44 = vld [vmem:[#allocation13 + $0x580] sm:$0xf]  ;;  %v4620_v54 = vor.u32 %v5247_v43, %v4619_v41 }
  0x64   :  { %724 = vmatpush.bf16.msra.mxu1 %v3576_v56  ;;  %v5183_v45 = vld [vmem:[#allocation13 + $0x59c] sm:$0xf0] }
  0x65   :  { %686 = vmatpush.bf16.msrb.mxu2 %v3428_v60  ;;  %v4075_v49 = vld [vmem:[#allocation13 + $0x340] sm:$0xf]  ;;  %v4364_v56 = vor.u32 %v5183_v45, %v4363_v44 }
  0x66   :  { %699 = vmatpush.bf16.msrb.mxu3 %v3556_v0  ;;  %v5111_v50 = vld [vmem:[#allocation13 + $0x35c] sm:$0xf0] }
  0x67   :  { %712 = vmatpush.bf16.msra.mxu0 %v3432_v1  ;;  %v3819_v52 = vld [vmem:[#allocation13 + $0x140] sm:$0xf]  ;;  %v4076_v60 = vor.u32 %v5111_v50, %v4075_v49 }
  0x68   :  { %725 = vmatpush.bf16.msra.mxu1 %v3560_v5  ;;  %v5047_v53 = vld [vmem:[#allocation13 + $0x15c] sm:$0xf0] }
  0x69   :  { %687 = vmatpush.bf16.msrb.mxu2 %v3412_v11  ;;  %v4587_v55 = vld [vmem:[#allocation13 + $0x740] sm:$0xf]  ;;  %v3820_v63 = vor.u32 %v5047_v53, %v3819_v52  ;;  %v4141_v53 = vld [vmem:[#allocation13 + $0x3e0] sm:$0xf0] }
  0x6a   :  { %700 = vmatpush.bf16.msrb.mxu3 %v3540_v12  ;;  %v5239_v57 = vld [vmem:[#allocation13 + $0x75c] sm:$0xf0] }
  0x6b   :  { %713 = vmatpush.bf16.msra.mxu0 %v3416_v13  ;;  %v4331_v58 = vld [vmem:[#allocation13 + $0x540] sm:$0xf]  ;;  %v4588_v2 = vor.u32 %v5239_v57, %v4587_v55  ;;  %v3885_v55 = vld [vmem:[#allocation13 + $0x1e0] sm:$0xf0] }
  0x6c   :  { %726 = vmatpush.bf16.msra.mxu1 %v3544_v14  ;;  %v5175_v59 = vld [vmem:[#allocation13 + $0x55c] sm:$0xf0] }
  0x6d   :  { %v4043_v61 = vld [vmem:[#allocation13 + $0x300] sm:$0xf]  ;;  %v4332_v4 = vor.u32 %v5175_v59, %v4331_v58 }
  0x6e   :  { %v5103_v62 = vld [vmem:[#allocation13 + $0x31c] sm:$0xf0] }
  0x6f   :  { %v3787_v0 = vld [vmem:[#allocation13 + $0x100] sm:$0xf]  ;;  %v4044_v8 = vor.u32 %v5103_v62, %v4043_v61  ;;  %v4653_v61 = vld [vmem:[#allocation13 + $0x7e0] sm:$0xf0] }
  0x70   :  { %v5039_v1 = vld [vmem:[#allocation13 + $0x11c] sm:$0xf0] }
  0x71   :  { %v4555_v3 = vld [vmem:[#allocation13 + $0x700] sm:$0xf]  ;;  %v3788_v11 = vor.u32 %v5039_v1, %v3787_v0  ;;  %v4109_v1 = vld [vmem:[#allocation13 + $0x3a0] sm:$0xf0] }
  0x72   :  { %v5231_v5 = vld [vmem:[#allocation13 + $0x71c] sm:$0xf0] }
  0x73   :  { %v4299_v6 = vld [vmem:[#allocation13 + $0x500] sm:$0xf]  ;;  %v4556_v14 = vor.u32 %v5231_v5, %v4555_v3  ;;  %v3853_v3 = vld [vmem:[#allocation13 + $0x1a0] sm:$0xf0] }
  0x74   :  { %v5167_v7 = vld [vmem:[#allocation13 + $0x51c] sm:$0xf0] }
  0x75   :  { %v4011_v9 = vld [vmem:[#allocation13 + $0x2c0] sm:$0xf] }
  0x76   :  { %v5095_v10 = vld [vmem:[#allocation13 + $0x2dc] sm:$0xf0] }
  0x77   :  { %v3755_v12 = vld [vmem:[#allocation13 + $0xc0] sm:$0xf] }
  0x78   :  { %v5031_v13 = vld [vmem:[#allocation13 + $0xdc] sm:$0xf0] }
  0x79   :  { %v4523_v15 = vld [vmem:[#allocation13 + $0x6c0] sm:$0xf]  ;;  %v3756_v23 = vor.u32 %v5031_v13, %v3755_v12  ;;  %v5099_v13 = vld [vmem:[#allocation13 + $0x304] sm:$0xf] }
  0x7a   :  { %v5087_v22 = vld [vmem:[#allocation13 + $0x29c] sm:$0xf0] }
  0x7b   :  { %v3723_v24 = vld [vmem:[#allocation13 + $0x80] sm:$0xf] }
  0x7c   :  { %v5023_v25 = vld [vmem:[#allocation13 + $0x9c] sm:$0xf0] }
  0x7d   :  { %v4491_v27 = vld [vmem:[#allocation13 + $0x680] sm:$0xf] }
  0x7e   :  { %v4235_v30 = vld [vmem:[#allocation13 + $0x480] sm:$0xf] }
  0x7f   :  { %v5151_v31 = vld [vmem:[#allocation13 + $0x49c] sm:$0xf0] }
  0x80   :  { %v3947_v35 = vld [vmem:[#allocation13 + $0x240] sm:$0xf] }
  0x81   :  { %v5079_v36 = vld [vmem:[#allocation13 + $0x25c] sm:$0xf0] }
  0x82   :  { %v3691_v38 = vld [vmem:[#allocation13 + $0x40] sm:$0xf] }
  0x83   :  { %v5015_v39 = vld [vmem:[#allocation13 + $0x5c] sm:$0xf0] }
  0x84   :  { %v4459_v41 = vld [vmem:[#allocation13 + $0x640] sm:$0xf] }
  0x85   :  { %v5207_v43 = vld [vmem:[#allocation13 + $0x65c] sm:$0xf0] }
  0x86   :  { %v4203_v44 = vld [vmem:[#allocation13 + $0x440] sm:$0xf] }
  0x87   :  { %v5143_v45 = vld [vmem:[#allocation13 + $0x45c] sm:$0xf0] }
  0x88   :  { %v3659_v49 = vld [vmem:[#allocation13] sm:$0xf]  ;;  %v4204_v52 = vor.u32 %v5143_v45, %v4203_v44  ;;  %v4589_v44 = vld [vmem:[#allocation13 + $0x760] sm:$0xf0] }
  0x89   :  { %v5007_v50 = vld [vmem:[#allocation13 + $0x1c] sm:$0xf0] }
  0x8a   :  { %v5199_v57 = vld [vmem:[#allocation13 + $0x61c] sm:$0xf0]  ;;  %v3660_v59 = vor.u32 %v5007_v50, %v3659_v49  ;;  %v5067_v50 = vld [vmem:[#allocation13 + $0x204] sm:$0xf] }
  0xb8   :  { %v223_v19 = vpop.f32.mrf.mxu1 }
  0xb9   :  { %v210_v18 = vpop.f32.mrf.mxu0  ;;  %v224_v21 = vadd.f32 %v223_v19, %v184_v17  ;;  %v5223_v17 = vld [vmem:[#allocation13 + $0x6dc] sm:$0xf0] }
  0xba   :  { %v211_v20 = vadd.f32 %v210_v18, %v183_v16  ;;  %v4300_v16 = vor.u32 %v5167_v7, %v4299_v6  ;;  %v4267_v18 = vld [vmem:[#allocation13 + $0x4c0] sm:$0xf]  ;;  %v4524_v26 = vor.u32 %v5223_v17, %v4523_v15  ;;  %v5107_v7 = vld [vmem:[#allocation13 + $0x344] sm:$0xf] }
  0xbb   :  { %v231_v29 = vmax.f32 %v224_v21, 0.0  ;;  %v5159_v19 = vld [vmem:[#allocation13 + $0x4dc] sm:$0xf0]  ;;  %v4045_v15 = vld [vmem:[#allocation13 + $0x320] sm:$0xf0] }
  0xbc   :  { %v230_v28 = vmax.f32 %v211_v20, 0.0  ;;  %v4012_v20 = vor.u32 %v5095_v10, %v4011_v9  ;;  %v3979_v21 = vld [vmem:[#allocation13 + $0x280] sm:$0xf]  ;;  %v4077_v9 = vld [vmem:[#allocation13 + $0x360] sm:$0xf0] }
  0xbd   :  { %v5709_v33 = vpack.c.bf16 %v231_v29, %v231_v29  ;;  %v5215_v29 = vld [vmem:[#allocation13 + $0x69c] sm:$0xf0]  ;;  %v5043_v10 = vld [vmem:[#allocation13 + $0x144] sm:$0xf]  ;;  %v4080_v12 = vor.u32 %v5107_v7, %v4077_v9 }
  0xbe   :  { %v5707_v32 = vpack.c.bf16 %v230_v28, %v230_v28  ;;  %v4268_v28 = vor.u32 %v5159_v19, %v4267_v18  ;;  %v3789_v17 = vld [vmem:[#allocation13 + $0x120] sm:$0xf0]  ;;  %v4048_v18 = vor.u32 %v5099_v13, %v4045_v15 }
  0xbf   :  { %649 = vmatmul.bf16.vlgmr.msra.gmra.mxu3 %v5709_v33  ;;  %675 = vmatmul.bf16.vlgmr.msrb.gmra.mxu1 %v5709_v33  ;;  %v5211_v7 = vld [vmem:[#allocation13 + $0x684] sm:$0xf] }
  0xc0   :  { %636 = vmatmul.bf16.vlgmr.msra.gmra.mxu2 %v5707_v32  ;;  %662 = vmatmul.bf16.vlgmr.msrb.gmra.mxu0 %v5707_v32  ;;  %v225_v47 = vpop.f32.mrf.mxu1  ;;  %v5203_v13 = vld [vmem:[#allocation13 + $0x644] sm:$0xf] }
  0xc1   :  { %v212_v46 = vpop.f32.mrf.mxu0  ;;  %2313 = vmatpush.bf16.msra.mxu3 %v4140_v34  ;;  %2300 = vmatpush.bf16.msra.mxu2 %v3884_v37  ;;  %v3980_v34 = vor.u32 %v5087_v22, %v3979_v21  ;;  %v3724_v37 = vor.u32 %v5023_v25, %v3723_v24  ;;  %v3692_v47 = vor.u32 %v5015_v39, %v3691_v38  ;;  %v4013_v21 = vld [vmem:[#allocation13 + $0x2e0] sm:$0xf0] }
  0xc2   :  { %2339 = vmatpush.bf16.msrb.mxu1 %v4652_v40  ;;  %2326 = vmatpush.bf16.msrb.mxu0 %v4396_v42  ;;  %v4492_v40 = vor.u32 %v5215_v29, %v4491_v27  ;;  %v4236_v42 = vor.u32 %v5151_v31, %v4235_v30  ;;  %v5071_v46 = vld [vmem:[#allocation13 + $0x21c] sm:$0xf0]  ;;  %v3981_v24 = vld [vmem:[#allocation13 + $0x2a0] sm:$0xf0] }
  0xc3   :  { %v5243_v25 = vld [vmem:[#allocation13 + $0x784] sm:$0xf]  ;;  %v5135_v29 = vld [vmem:[#allocation13 + $0x41c] sm:$0xf0] }
  0xc4   :  { %v4621_v27 = vld [vmem:[#allocation13 + $0x7a0] sm:$0xf0] }
  0xc5   :  { %2314 = vmatpush.bf16.msra.mxu3 %v4108_v48  ;;  %2301 = vmatpush.bf16.msra.mxu2 %v3852_v51  ;;  %v5123_v48 = vld [vmem:[#allocation13 + $0x3c4] sm:$0xf]  ;;  %v4460_v51 = vor.u32 %v5207_v43, %v4459_v41  ;;  %v4624_v30 = vor.u32 %v5243_v25, %v4621_v27  ;;  %v5722_v25 = vld [vmem:[%s5817_s6] sm:$0xf] }
  0xc6   :  { %2340 = vmatpush.bf16.msrb.mxu1 %v4620_v54  ;;  %2327 = vmatpush.bf16.msrb.mxu0 %v4364_v56  ;;  %v5059_v54 = vld [vmem:[#allocation13 + $0x1c4] sm:$0xf]  ;;  %v4427_v56 = vld [vmem:[#allocation13 + $0x600] sm:$0xf]  ;;  %v4144_v62 = vor.u32 %v5123_v48, %v4141_v53 }
  0xc7   :  { %v3888_v0 = vor.u32 %v5059_v54, %v3885_v55  ;;  %v4397_v38 = vld [vmem:[#allocation13 + $0x5e0] sm:$0xf0] }
  0xc8   :  { %v3949_v41 = vld [vmem:[#allocation13 + $0x260] sm:$0xf0] }
  0xc9   :  { %2315 = vmatpush.bf16.msra.mxu3 %v4076_v60  ;;  %2302 = vmatpush.bf16.msra.mxu2 %v3820_v63  ;;  %v5251_v60 = vld [vmem:[#allocation13 + $0x7c4] sm:$0xf] }
  0xca   :  { %2341 = vmatpush.bf16.msrb.mxu1 %v4588_v2  ;;  %2328 = vmatpush.bf16.msrb.mxu0 %v4332_v4  ;;  %v5115_v63 = vld [vmem:[#allocation13 + $0x384] sm:$0xf]  ;;  %v4428_v4 = vor.u32 %v5199_v57, %v4427_v56  ;;  %v4656_v5 = vor.u32 %v5251_v60, %v4653_v61 }
  0xcb   :  { %v5051_v2 = vld [vmem:[#allocation13 + $0x184] sm:$0xf]  ;;  %v4112_v6 = vor.u32 %v5115_v63, %v4109_v1 }
  0xcc   :  { %v4365_v48 = vld [vmem:[#allocation13 + $0x5a0] sm:$0xf0] }
  0xcd   :  { %2316 = vmatpush.bf16.msra.mxu3 %v4044_v8  ;;  %2303 = vmatpush.bf16.msra.mxu2 %v3788_v11  ;;  %v3856_v8 = vor.u32 %v5051_v2, %v3853_v3  ;;  %v3821_v11 = vld [vmem:[#allocation13 + $0x160] sm:$0xf0] }
  0xce   :  { %2342 = vmatpush.bf16.msrb.mxu1 %v4556_v14  ;;  %2329 = vmatpush.bf16.msrb.mxu0 %v4300_v16  ;;  %v3824_v14 = vor.u32 %v5043_v10, %v3821_v11  ;;  %v5035_v16 = vld [vmem:[#allocation13 + $0x104] sm:$0xf] }
  0xcf   :  { %701 = vmatmul.bf16.vlgmr.msrb.gmra.mxu3 %v5709_v33  ;;  %727 = vmatmul.bf16.vlgmr.msra.gmra.mxu1 %v5709_v33  ;;  %v3915_v33 = vld [vmem:[#allocation13 + $0x200] sm:$0xf]  ;;  %v3792_v19 = vor.u32 %v5035_v16, %v3789_v17  ;;  %v5227_v53 = vld [vmem:[#allocation13 + $0x704] sm:$0xf] }
  0xd0   :  { %688 = vmatmul.bf16.vlgmr.msrb.gmra.mxu2 %v5707_v32  ;;  %714 = vmatmul.bf16.vlgmr.msra.gmra.mxu0 %v5707_v32  ;;  %v3948_v32 = vor.u32 %v5079_v36, %v3947_v35  ;;  %v3916_v58 = vor.u32 %v5071_v46, %v3915_v33  ;;  %v3757_v35 = vld [vmem:[#allocation13 + $0xe0] sm:$0xf0] }
  0xd1   :  { %2317 = vmatpush.bf16.msra.mxu3 %v4012_v20  ;;  %2304 = vmatpush.bf16.msra.mxu2 %v3756_v23  ;;  %v5091_v20 = vld [vmem:[#allocation13 + $0x2c4] sm:$0xf] }
  0xd2   :  { %2343 = vmatpush.bf16.msrb.mxu1 %v4524_v26  ;;  %2330 = vmatpush.bf16.msrb.mxu0 %v4268_v28  ;;  %v4016_v22 = vor.u32 %v5091_v20, %v4013_v21  ;;  %v5083_v23 = vld [vmem:[#allocation13 + $0x284] sm:$0xf]  ;;  %v4171_v28 = vld [vmem:[#allocation13 + $0x400] sm:$0xf] }
  0xd3   :  { %v3984_v26 = vor.u32 %v5083_v23, %v3981_v24  ;;  %v4172_v31 = vor.u32 %v5135_v29, %v4171_v28  ;;  %v5187_v36 = vld [vmem:[#allocation13 + $0x5c4] sm:$0xf]  ;;  %v301_v28 = vperm.slane %v5722_v25, 1 }
  0xd4   :  { %v4400_v39 = vor.u32 %v5187_v36, %v4397_v38  ;;  %v3725_v33 = vld [vmem:[#allocation13 + $0xa0] sm:$0xf0]  ;;  %v5128_v38 = vld [vmem:[#allocation13 + $0x3e4] sm:$0xf0] }
  0xd5   :  { %2318 = vmatpush.bf16.msra.mxu3 %v3980_v34  ;;  %2305 = vmatpush.bf16.msra.mxu2 %v3724_v37  ;;  %v5027_v34 = vld [vmem:[#allocation13 + $0xc4] sm:$0xf] }
  0xd6   :  { %2344 = vmatpush.bf16.msrb.mxu1 %v4492_v40  ;;  %2331 = vmatpush.bf16.msrb.mxu0 %v4236_v42  ;;  %v3760_v37 = vor.u32 %v5027_v34, %v3757_v35  ;;  %v5075_v40 = vld [vmem:[#allocation13 + $0x244] sm:$0xf]  ;;  %v300_v35 = vperm.slane %v5722_v25, 0 }
  0xd7   :  { %v5235_v42 = vld [vmem:[#allocation13 + $0x744] sm:$0xf]  ;;  %v3952_v43 = vor.u32 %v5075_v40, %v3949_v41 }
  0xd8   :  { %v4592_v45 = vor.u32 %v5235_v42, %v4589_v44  ;;  %v5179_v46 = vld [vmem:[#allocation13 + $0x584] sm:$0xf] }
  0xd9   :  { %2319 = vmatpush.bf16.msra.mxu3 %v3948_v32  ;;  %2306 = vmatpush.bf16.msra.mxu2 %v3692_v47  ;;  %v5019_v32 = vld [vmem:[#allocation13 + $0x84] sm:$0xf]  ;;  %v4368_v49 = vor.u32 %v5179_v46, %v4365_v48  ;;  %v3891_v48 = vld [vmem:[#allocation13 + $0x1c8] sm:$0xf] }
  0xda   :  { %2345 = vmatpush.bf16.msrb.mxu1 %v4460_v51  ;;  %2332 = vmatpush.bf16.msrb.mxu0 %v4204_v52  ;;  %v3728_v47 = vor.u32 %v5019_v32, %v3725_v33  ;;  %v3917_v51 = vld [vmem:[#allocation13 + $0x220] sm:$0xf0]  ;;  %v5120_v32 = vld [vmem:[#allocation13 + $0x3a4] sm:$0xf0] }
  0xdb   :  { %v3920_v52 = vor.u32 %v5067_v50, %v3917_v51  ;;  %v4557_v54 = vld [vmem:[#allocation13 + $0x720] sm:$0xf0] }
  0xdc   :  { %v4560_v55 = vor.u32 %v5227_v53, %v4557_v54  ;;  %v5011_v56 = vld [vmem:[#allocation13 + $0x44] sm:$0xf]  ;;  %v4083_v53 = vld [vmem:[#allocation13 + $0x348] sm:$0xf] }
  0xdd   :  { %2320 = vmatpush.bf16.msra.mxu3 %v3916_v58  ;;  %2307 = vmatpush.bf16.msra.mxu2 %v3660_v59  ;;  %v3693_v57 = vld [vmem:[#allocation13 + $0x60] sm:$0xf0]  ;;  %v5112_v54 = vld [vmem:[#allocation13 + $0x364] sm:$0xf0] }
  0xde   :  { %2346 = vmatpush.bf16.msrb.mxu1 %v4428_v4  ;;  %2333 = vmatpush.bf16.msrb.mxu0 %v4172_v31  ;;  %v5171_v58 = vld [vmem:[#allocation13 + $0x544] sm:$0xf]  ;;  %v3696_v59 = vor.u32 %v5011_v56, %v3693_v57  ;;  %v3859_v56 = vld [vmem:[#allocation13 + $0x188] sm:$0xf] }
  0xdf   :  { %v4333_v60 = vld [vmem:[#allocation13 + $0x560] sm:$0xf0]  ;;  %v5056_v57 = vld [vmem:[#allocation13 + $0x1a4] sm:$0xf0] }
  0xe0   :  { %v4336_v61 = vor.u32 %v5171_v58, %v4333_v60  ;;  %v4525_v63 = vld [vmem:[#allocation13 + $0x6e0] sm:$0xf0]  ;;  %v303_v60 = vperm.slane %v5722_v25, 3 }
  0xe1   :  { %2365 = vmatpush.bf16.msrb.mxu3 %v4144_v62  ;;  %2352 = vmatpush.bf16.msrb.mxu2 %v3888_v0  ;;  %v5219_v62 = vld [vmem:[#allocation13 + $0x6c4] sm:$0xf] }
  0xe2   :  { %2391 = vmatpush.bf16.msra.mxu1 %v4656_v5  ;;  %2378 = vmatpush.bf16.msra.mxu0 %v4400_v39  ;;  %v4528_v0 = vor.u32 %v5219_v62, %v4525_v63  ;;  %v5003_v1 = vld [vmem:[#allocation13 + $0x4] sm:$0xf]  ;;  %v3860_v62 = vor.u32 %v5056_v57, %v3859_v56  ;;  %v4051_v63 = vld [vmem:[#allocation13 + $0x308] sm:$0xf] }
  0xe3   :  { %v3661_v2 = vld [vmem:[#allocation13 + $0x20] sm:$0xf0]  ;;  %v5072_v56 = vld [vmem:[#allocation13 + $0x224] sm:$0xf0] }
  0xe4   :  { %v5163_v3 = vld [vmem:[#allocation13 + $0x504] sm:$0xf]  ;;  %v3664_v4 = vor.u32 %v5003_v1, %v3661_v2  ;;  %v4563_v57 = vld [vmem:[#allocation13 + $0x708] sm:$0xf] }
  0xe5   :  { %2366 = vmatpush.bf16.msrb.mxu3 %v4112_v6  ;;  %2353 = vmatpush.bf16.msrb.mxu2 %v3856_v8  ;;  %v4301_v5 = vld [vmem:[#allocation13 + $0x520] sm:$0xf0] }
  0xe6   :  { %2392 = vmatpush.bf16.msra.mxu1 %v4624_v30  ;;  %2379 = vmatpush.bf16.msra.mxu0 %v4368_v49  ;;  %v4304_v6 = vor.u32 %v5163_v3, %v4301_v5  ;;  %v4493_v8 = vld [vmem:[#allocation13 + $0x6a0] sm:$0xf0]  ;;  %v5064_v49 = vld [vmem:[#allocation13 + $0x1e4] sm:$0xf0] }
  0xe7   :  { %v4496_v9 = vor.u32 %v5211_v7, %v4493_v8  ;;  %v5155_v10 = vld [vmem:[#allocation13 + $0x4c4] sm:$0xf]  ;;  %v3827_v3 = vld [vmem:[#allocation13 + $0x148] sm:$0xf]  ;;  %v302_v7 = vperm.slane %v5722_v25, 2 }
  0xe8   :  { %v4269_v11 = vld [vmem:[#allocation13 + $0x4e0] sm:$0xf0]  ;;  %v4019_v8 = vld [vmem:[#allocation13 + $0x2c8] sm:$0xf] }
  0xe9   :  { %2367 = vmatpush.bf16.msrb.mxu3 %v4080_v12  ;;  %2354 = vmatpush.bf16.msrb.mxu2 %v3824_v14  ;;  %v4272_v12 = vor.u32 %v5155_v10, %v4269_v11  ;;  %v4461_v14 = vld [vmem:[#allocation13 + $0x660] sm:$0xf0]  ;;  %v5096_v11 = vld [vmem:[#allocation13 + $0x2e4] sm:$0xf0] }
  0xea   :  { %2393 = vmatpush.bf16.msra.mxu1 %v4592_v45  ;;  %2380 = vmatpush.bf16.msra.mxu0 %v4336_v61  ;;  %v4464_v15 = vor.u32 %v5203_v13, %v4461_v14  ;;  %v5147_v16 = vld [vmem:[#allocation13 + $0x484] sm:$0xf]  ;;  %v4115_v45 = vld [vmem:[#allocation13 + $0x388] sm:$0xf]  ;;  %v4084_v61 = vor.u32 %v5112_v54, %v4083_v53 }
  0xeb   :  { %v4237_v17 = vld [vmem:[#allocation13 + $0x4a0] sm:$0xf0]  ;;  %v4116_v51 = vor.u32 %v5120_v32, %v4115_v45  ;;  %v5256_v13 = vld [vmem:[#allocation13 + $0x7e4] sm:$0xf0] }
  0xec   :  { %v4429_v20 = vld [vmem:[#allocation13 + $0x620] sm:$0xf0]  ;;  %v3795_v14 = vld [vmem:[#allocation13 + $0x108] sm:$0xf] }
  0xed   :  { %2368 = vmatpush.bf16.msrb.mxu3 %v4048_v18  ;;  %2355 = vmatpush.bf16.msrb.mxu2 %v3792_v19  ;;  %v4240_v18 = vor.u32 %v5147_v16, %v4237_v17  ;;  %v5195_v19 = vld [vmem:[#allocation13 + $0x604] sm:$0xf]  ;;  %v5088_v25 = vld [vmem:[#allocation13 + $0x2a4] sm:$0xf0] }
  0xee   :  { %2394 = vmatpush.bf16.msra.mxu1 %v4560_v55  ;;  %2381 = vmatpush.bf16.msra.mxu0 %v4304_v6  ;;  %v4432_v21 = vor.u32 %v5195_v19, %v4429_v20  ;;  %v4205_v23 = vld [vmem:[#allocation13 + $0x460] sm:$0xf0]  ;;  %v4020_v20 = vor.u32 %v5096_v11, %v4019_v8  ;;  %v3923_v54 = vld [vmem:[#allocation13 + $0x208] sm:$0xf]  ;;  %v4117_v11 = vld [vmem:[#allocation13 + $0x3a8] sm:$0xf0] }
  0xef   :  { %v4173_v27 = vld [vmem:[#allocation13 + $0x420] sm:$0xf0] }
  0xf1   :  { %2369 = vmatpush.bf16.msrb.mxu3 %v4016_v22  ;;  %2356 = vmatpush.bf16.msrb.mxu2 %v3760_v37  ;;  %v5139_v22 = vld [vmem:[#allocation13 + $0x444] sm:$0xf]  ;;  %v4147_v37 = vld [vmem:[#allocation13 + $0x3c8] sm:$0xf] }
  0xf2   :  { %2395 = vmatpush.bf16.msra.mxu1 %v4528_v0  ;;  %2382 = vmatpush.bf16.msra.mxu0 %v4272_v12  ;;  %v4208_v24 = vor.u32 %v5139_v22, %v4205_v23  ;;  %v5104_v0 = vld [vmem:[#allocation13 + $0x324] sm:$0xf0] }
  0xf3   :  { %v4052_v6 = vor.u32 %v5104_v0, %v4051_v63  ;;  %v4659_v12 = vld [vmem:[#allocation13 + $0x7c8] sm:$0xf] }
  0xf4   :  { %v3987_v22 = vld [vmem:[#allocation13 + $0x288] sm:$0xf] }
  0xf5   :  { %2370 = vmatpush.bf16.msrb.mxu3 %v3984_v26  ;;  %2357 = vmatpush.bf16.msrb.mxu2 %v3728_v47  ;;  %v5131_v26 = vld [vmem:[#allocation13 + $0x404] sm:$0xf]  ;;  %v3699_v63 = vld [vmem:[#allocation13 + $0x48] sm:$0xf] }
  0xf6   :  { %2396 = vmatpush.bf16.msra.mxu1 %v4496_v9  ;;  %2383 = vmatpush.bf16.msra.mxu0 %v4240_v18  ;;  %v4176_v29 = vor.u32 %v5131_v26, %v4173_v27  ;;  %v4627_v26 = vld [vmem:[#allocation13 + $0x788] sm:$0xf] }
  0xf7   :  { %v5248_v27 = vld [vmem:[#allocation13 + $0x7a4] sm:$0xf0] }
  0xf8   :  { %v5016_v0 = vld [vmem:[#allocation13 + $0x64] sm:$0xf0] }
  0xf9   :  { %2371 = vmatpush.bf16.msrb.mxu3 %v3952_v43  ;;  %2358 = vmatpush.bf16.msrb.mxu2 %v3696_v59  ;;  %v4148_v43 = vor.u32 %v5128_v38, %v4147_v37  ;;  %v3988_v38 = vor.u32 %v5088_v25, %v3987_v22  ;;  %v3700_v8 = vor.u32 %v5016_v0, %v3699_v63  ;;  %v5108_v25 = vld [vmem:[#allocation13 + $0x34c] sm:$0xf] }
  0xfa   :  { %2397 = vmatpush.bf16.msra.mxu1 %v4464_v15  ;;  %2384 = vmatpush.bf16.msra.mxu0 %v4208_v24  ;;  %v5040_v15 = vld [vmem:[#allocation13 + $0x124] sm:$0xf0]  ;;  %v5084_v0 = vld [vmem:[#allocation13 + $0x28c] sm:$0xf] }
  0xfb   :  { %v3796_v24 = vor.u32 %v5040_v15, %v3795_v14  ;;  %v4307_v14 = vld [vmem:[#allocation13 + $0x508] sm:$0xf] }
  0xfc   :  { %v5168_v15 = vld [vmem:[#allocation13 + $0x524] sm:$0xf0] }
  0xfd   :  { %2372 = vmatpush.bf16.msrb.mxu3 %v3920_v52  ;;  %2359 = vmatpush.bf16.msrb.mxu2 %v3664_v4  ;;  %v3892_v52 = vor.u32 %v5064_v49, %v3891_v48  ;;  %v5048_v4 = vld [vmem:[#allocation13 + $0x164] sm:$0xf0] }
  0xfe   :  { %2398 = vmatpush.bf16.msra.mxu1 %v4432_v21  ;;  %2385 = vmatpush.bf16.msra.mxu0 %v4176_v29  ;;  %v3828_v10 = vor.u32 %v5048_v4, %v3827_v3  ;;  %v4660_v21 = vor.u32 %v5256_v13, %v4659_v12  ;;  %v5024_v49 = vld [vmem:[#allocation13 + $0xa4] sm:$0xf0]  ;;  %v3924_v3 = vor.u32 %v5072_v56, %v3923_v54  ;;  %v4661_v54 = vld [vmem:[#allocation13 + $0x7e8] sm:$0xf0] }
  0xff   :  { %v3667_v12 = vld [vmem:[#allocation13 + $0x8] sm:$0xf] }
 0x100   :  { %v5008_v13 = vld [vmem:[#allocation13 + $0x24] sm:$0xf0] }
 0x101   :  { %v3668_v22 = vor.u32 %v5008_v13, %v3667_v12 }
 0x13c   :  { %v676_v31 = vpop.f32.mrf.mxu1 }
 0x13d   :  { %v663_v30 = vpop.f32.mrf.mxu0 }
 0x13e   :  { %v664_v34 = vadd.f32 %v663_v30, %v301_v28 }
 0x140   :  { %v677_v36 = vadd.f32 %v676_v31, %v664_v34  ;;  %v3763_v31 = vld [vmem:[#allocation13 + $0xc8] sm:$0xf] }
 0x141   :  { %v5032_v34 = vld [vmem:[#allocation13 + $0xe4] sm:$0xf0] }
 0x142   :  { %v739_v39 = vmax.f32 %v677_v36, 0.0  ;;  %v650_v41 = vpop.f32.mrf.mxu3  ;;  %v5192_v36 = vld [vmem:[#allocation13 + $0x5e4] sm:$0xf0]  ;;  %v3764_v32 = vor.u32 %v5032_v34, %v3763_v31  ;;  %v5052_v31 = vld [vmem:[#allocation13 + $0x18c] sm:$0xf] }
 0x143   :  { %v637_v40 = vpop.f32.mrf.mxu2  ;;  %v3861_v34 = vld [vmem:[#allocation13 + $0x1a8] sm:$0xf0] }
 0x144   :  { %v638_v42 = vadd.f32 %v637_v40, %v300_v35  ;;  %v5726_v44 = vpack.c.bf16 %v739_v39, %v739_v39  ;;  %v678_v47 = vpop.f32.mrf.mxu1  ;;  %v4403_v35 = vld [vmem:[#allocation13 + $0x5c8] sm:$0xf]  ;;  %v4628_v39 = vor.u32 %v5248_v27, %v4627_v26  ;;  %v4085_v26 = vld [vmem:[#allocation13 + $0x368] sm:$0xf0] }
 0x145   :  { %v665_v46 = vpop.f32.mrf.mxu0  ;;  %v3955_v40 = vld [vmem:[#allocation13 + $0x248] sm:$0xf] }
 0x146   :  { %v651_v33 = vadd.f32 %v650_v41, %v638_v42  ;;  %2321 = vmatmul.bf16.vlgmr.msra.gmra.mxu3 %v5726_v44  ;;  %v5080_v41 = vld [vmem:[#allocation13 + $0x264] sm:$0xf0] }
 0x147   :  { %2417 = vmatpush.bf16.msra.mxu3 %v4148_v43  ;;  %v4595_v42 = vld [vmem:[#allocation13 + $0x748] sm:$0xf] }
 0x148   :  { %v738_v50 = vmax.f32 %v651_v33, 0.0  ;;  %v5240_v43 = vld [vmem:[#allocation13 + $0x764] sm:$0xf0]  ;;  %v4404_v33 = vor.u32 %v5192_v36, %v4403_v35  ;;  %v4088_v35 = vor.u32 %v5108_v25, %v4085_v26  ;;  %v4373_v25 = vld [vmem:[#allocation13 + $0x5a8] sm:$0xf0] }
 0x149   :  { %v3731_v46 = vld [vmem:[#allocation13 + $0x88] sm:$0xf]  ;;  %v4596_v53 = vor.u32 %v5240_v43, %v4595_v42 }
 0x14a   :  { %v5729_v55 = vpack.c.bf16 %v738_v50, %v738_v50  ;;  %v652_v59 = vpop.f32.mrf.mxu3  ;;  %v4371_v50 = vld [vmem:[#allocation13 + $0x588] sm:$0xf] }
 0x14b   :  { %v639_v58 = vpop.f32.mrf.mxu2  ;;  %2418 = vmatpush.bf16.msra.mxu3 %v4116_v51  ;;  %v5184_v51 = vld [vmem:[#allocation13 + $0x5a4] sm:$0xf0]  ;;  %v3732_v59 = vor.u32 %v5024_v49, %v3731_v46  ;;  %v3829_v46 = vld [vmem:[#allocation13 + $0x168] sm:$0xf0] }
 0x14c   :  { %2308 = vmatmul.bf16.vlgmr.msra.gmra.mxu2 %v5729_v55  ;;  %v728_v2 = vpop.f32.mrf.mxu1  ;;  %v5232_v58 = vld [vmem:[#allocation13 + $0x724] sm:$0xf0] }
 0x14d   :  { %2404 = vmatpush.bf16.msra.mxu2 %v3892_v52  ;;  %v715_v1 = vpop.f32.mrf.mxu0  ;;  %v3956_v52 = vor.u32 %v5080_v41, %v3955_v40  ;;  %v4564_v4 = vor.u32 %v5232_v58, %v4563_v57  ;;  %v4467_v36 = vld [vmem:[#allocation13 + $0x648] sm:$0xf]  ;;  %v4053_v40 = vld [vmem:[#allocation13 + $0x328] sm:$0xf0]  ;;  %v3864_v41 = vor.u32 %v5052_v31, %v3861_v34 }
 0x14e   :  { %v716_v5 = vadd.f32 %v715_v1, %v303_v60  ;;  %v4372_v60 = vor.u32 %v5184_v51, %v4371_v50  ;;  %v4339_v1 = vld [vmem:[#allocation13 + $0x548] sm:$0xf]  ;;  %v5092_v50 = vld [vmem:[#allocation13 + $0x2cc] sm:$0xf] }
 0x14f   :  { %2419 = vmatpush.bf16.msra.mxu3 %v4084_v61  ;;  %v5124_v61 = vld [vmem:[#allocation13 + $0x3cc] sm:$0xf]  ;;  %v4243_v42 = vld [vmem:[#allocation13 + $0x488] sm:$0xf] }
 0x150   :  { %v729_v9 = vadd.f32 %v728_v2, %v716_v5  ;;  %v5176_v2 = vld [vmem:[#allocation13 + $0x564] sm:$0xf0]  ;;  %v4565_v31 = vld [vmem:[#allocation13 + $0x728] sm:$0xf0] }
 0x151   :  { %2405 = vmatpush.bf16.msra.mxu2 %v3860_v62  ;;  %v4149_v62 = vld [vmem:[#allocation13 + $0x3e8] sm:$0xf0]  ;;  %v5152_v43 = vld [vmem:[#allocation13 + $0x4a4] sm:$0xf0] }
 0x152   :  { %v741_v16 = vmax.f32 %v729_v9, 0.0  ;;  %v702_v18 = vpop.f32.mrf.mxu3  ;;  %v4152_v5 = vor.u32 %v5124_v61, %v4149_v62  ;;  %v4340_v9 = vor.u32 %v5176_v2, %v4339_v1  ;;  %v5200_v49 = vld [vmem:[#allocation13 + $0x624] sm:$0xf0]  ;;  %v4244_v51 = vor.u32 %v5152_v43, %v4243_v42  ;;  %v3797_v61 = vld [vmem:[#allocation13 + $0x128] sm:$0xf0] }
 0x153   :  { %v689_v17 = vpop.f32.mrf.mxu2  ;;  %2420 = vmatpush.bf16.msra.mxu3 %v4052_v6  ;;  %v4531_v6 = vld [vmem:[#allocation13 + $0x6c8] sm:$0xf]  ;;  %v3989_v2 = vld [vmem:[#allocation13 + $0x2a8] sm:$0xf0] }
 0x154   :  { %v690_v19 = vadd.f32 %v689_v17, %v302_v7  ;;  %v5734_v23 = vpack.c.bf16 %v741_v16, %v741_v16  ;;  %v730_v30 = vpop.f32.mrf.mxu1  ;;  %v5224_v7 = vld [vmem:[#allocation13 + $0x6e4] sm:$0xf0]  ;;  %v5060_v17 = vld [vmem:[#allocation13 + $0x1cc] sm:$0xf]  ;;  %v3992_v12 = vor.u32 %v5084_v0, %v3989_v2  ;;  %v4091_v0 = vld [vmem:[#allocation13 + $0x350] sm:$0xf] }
 0x155   :  { %2406 = vmatpush.bf16.msra.mxu2 %v3828_v10  ;;  %v717_v29 = vpop.f32.mrf.mxu0  ;;  %v5116_v10 = vld [vmem:[#allocation13 + $0x38c] sm:$0xf]  ;;  %v4532_v16 = vor.u32 %v5224_v7, %v4531_v6  ;;  %v4211_v57 = vld [vmem:[#allocation13 + $0x448] sm:$0xf] }
 0x156   :  { %v703_v28 = vadd.f32 %v702_v18, %v690_v19  ;;  %2347 = vmatmul.bf16.vlgmr.msrb.gmra.mxu1 %v5734_v23  ;;  %2373 = vmatmul.bf16.vlgmr.msrb.gmra.mxu3 %v5726_v44  ;;  %v3893_v18 = vld [vmem:[#allocation13 + $0x1e8] sm:$0xf0]  ;;  %v4120_v19 = vor.u32 %v5116_v10, %v4117_v11  ;;  %v5160_v29 = vld [vmem:[#allocation13 + $0x4e4] sm:$0xf0] }
 0x157   :  { %2421 = vmatpush.bf16.msra.mxu3 %v4020_v20  ;;  %2443 = vmatpush.bf16.msrb.mxu1 %v4660_v21  ;;  %v4499_v20 = vld [vmem:[#allocation13 + $0x688] sm:$0xf]  ;;  %v3896_v27 = vor.u32 %v5060_v17, %v3893_v18  ;;  %v5188_v10 = vld [vmem:[#allocation13 + $0x5cc] sm:$0xf] }
 0x158   :  { %v740_v37 = vmax.f32 %v703_v28, 0.0  ;;  %v5216_v21 = vld [vmem:[#allocation13 + $0x6a4] sm:$0xf0]  ;;  %v4405_v11 = vld [vmem:[#allocation13 + $0x5e8] sm:$0xf0] }
 0x159   :  { %2407 = vmatpush.bf16.msra.mxu2 %v3796_v24  ;;  %v4308_v24 = vor.u32 %v5168_v15, %v4307_v14  ;;  %v4275_v28 = vld [vmem:[#allocation13 + $0x4c8] sm:$0xf]  ;;  %v4500_v30 = vor.u32 %v5216_v21, %v4499_v20  ;;  %v5076_v14 = vld [vmem:[#allocation13 + $0x24c] sm:$0xf]  ;;  %v4408_v20 = vor.u32 %v5188_v10, %v4405_v11 }
 0x15a   :  { %v5738_v45 = vpack.c.bf16 %v740_v37, %v740_v37  ;;  %v704_v48 = vpop.f32.mrf.mxu3  ;;  %v5208_v37 = vld [vmem:[#allocation13 + $0x664] sm:$0xf0]  ;;  %v5236_v17 = vld [vmem:[#allocation13 + $0x74c] sm:$0xf] }
 0x15b   :  { %v691_v47 = vpop.f32.mrf.mxu2  ;;  %2422 = vmatpush.bf16.msra.mxu3 %v3988_v38  ;;  %2444 = vmatpush.bf16.msrb.mxu1 %v4628_v39  ;;  %v4276_v38 = vor.u32 %v5160_v29, %v4275_v28  ;;  %v5100_v39 = vld [vmem:[#allocation13 + $0x30c] sm:$0xf]  ;;  %v4435_v48 = vld [vmem:[#allocation13 + $0x608] sm:$0xf] }
 0x15c   :  { %2334 = vmatmul.bf16.vlgmr.msrb.gmra.mxu0 %v5738_v45  ;;  %2360 = vmatmul.bf16.vlgmr.msrb.gmra.mxu2 %v5729_v55  ;;  %v4056_v47 = vor.u32 %v5100_v39, %v4053_v40  ;;  %v5144_v58 = vld [vmem:[#allocation13 + $0x464] sm:$0xf0]  ;;  %v4597_v18 = vld [vmem:[#allocation13 + $0x768] sm:$0xf0] }
 0x15d   :  { %2408 = vmatpush.bf16.msra.mxu2 %v3764_v32  ;;  %2430 = vmatpush.bf16.msrb.mxu0 %v4404_v33  ;;  %v4468_v32 = vor.u32 %v5208_v37, %v4467_v36  ;;  %v5044_v33 = vld [vmem:[#allocation13 + $0x14c] sm:$0xf]  ;;  %v4212_v1 = vor.u32 %v5144_v58, %v4211_v57  ;;  %v4179_v6 = vld [vmem:[#allocation13 + $0x408] sm:$0xf]  ;;  %v4155_v36 = vld [vmem:[#allocation13 + $0x3d0] sm:$0xf] }
 0x15e   :  { %v3832_v56 = vor.u32 %v5044_v33, %v3829_v46  ;;  %v5136_v7 = vld [vmem:[#allocation13 + $0x424] sm:$0xf0]  ;;  %v5020_v21 = vld [vmem:[#allocation13 + $0x8c] sm:$0xf]  ;;  %v5129_v37 = vld [vmem:[#allocation13 + $0x3ec] sm:$0xf0] }
 0x15f   :  { %2423 = vmatpush.bf16.msra.mxu3 %v3956_v52  ;;  %2445 = vmatpush.bf16.msrb.mxu1 %v4596_v53  ;;  %v4021_v52 = vld [vmem:[#allocation13 + $0x2e8] sm:$0xf0]  ;;  %v4180_v15 = vor.u32 %v5136_v7, %v4179_v6  ;;  %v3899_v57 = vld [vmem:[#allocation13 + $0x1d0] sm:$0xf] }
 0x160   :  { %v5252_v53 = vld [vmem:[#allocation13 + $0x7cc] sm:$0xf]  ;;  %v4024_v62 = vor.u32 %v5092_v50, %v4021_v52  ;;  %v5121_v50 = vld [vmem:[#allocation13 + $0x3ac] sm:$0xf0] }
 0x161   :  { %2409 = vmatpush.bf16.msra.mxu2 %v3732_v59  ;;  %2431 = vmatpush.bf16.msrb.mxu0 %v4372_v60  ;;  %v4436_v59 = vor.u32 %v5200_v49, %v4435_v48  ;;  %v5036_v60 = vld [vmem:[#allocation13 + $0x10c] sm:$0xf]  ;;  %v4664_v63 = vor.u32 %v5252_v53, %v4661_v54  ;;  %v4123_v49 = vld [vmem:[#allocation13 + $0x390] sm:$0xf] }
 0x162   :  { %v5068_v28 = vld [vmem:[#allocation13 + $0x20c] sm:$0xf]  ;;  %v5065_v58 = vld [vmem:[#allocation13 + $0x1ec] sm:$0xf0] }
 0x163   :  { %2424 = vmatpush.bf16.msra.mxu3 %v3924_v3  ;;  %2446 = vmatpush.bf16.msrb.mxu1 %v4564_v4  ;;  %v5244_v3 = vld [vmem:[#allocation13 + $0x78c] sm:$0xf]  ;;  %v3900_v2 = vor.u32 %v5065_v58, %v3899_v57  ;;  %v3867_v6 = vld [vmem:[#allocation13 + $0x190] sm:$0xf] }
 0x164   :  { %v4629_v4 = vld [vmem:[#allocation13 + $0x7a8] sm:$0xf0]  ;;  %v5057_v7 = vld [vmem:[#allocation13 + $0x1ac] sm:$0xf0] }
 0x165   :  { %2410 = vmatpush.bf16.msra.mxu2 %v3700_v8  ;;  %2432 = vmatpush.bf16.msrb.mxu0 %v4340_v9  ;;  %v5028_v8 = vld [vmem:[#allocation13 + $0xcc] sm:$0xf]  ;;  %v4632_v13 = vor.u32 %v5244_v3, %v4629_v4 }
 0x166   :  { %2399 = vmatmul.bf16.vlgmr.msra.gmra.mxu1 %v5734_v23  ;;  %2425 = vmatmul.bf16.vlgmr.msra.gmra.mxu3 %v5726_v44  ;;  %v3765_v9 = vld [vmem:[#allocation13 + $0xe8] sm:$0xf0] }
 0x167   :  { %2469 = vmatpush.bf16.msrb.mxu3 %v4152_v5  ;;  %2447 = vmatpush.bf16.msrb.mxu1 %v4532_v16  ;;  %v3800_v5 = vor.u32 %v5036_v60, %v3797_v61  ;;  %v3957_v16 = vld [vmem:[#allocation13 + $0x268] sm:$0xf0] }
 0x168   :  { %v3960_v26 = vor.u32 %v5076_v14, %v3957_v16  ;;  %v3925_v29 = vld [vmem:[#allocation13 + $0x228] sm:$0xf0]  ;;  %v3868_v14 = vor.u32 %v5057_v7, %v3867_v6  ;;  %v5233_v6 = vld [vmem:[#allocation13 + $0x72c] sm:$0xf0] }
 0x169   :  { %2411 = vmatpush.bf16.msra.mxu2 %v3668_v22  ;;  %2433 = vmatpush.bf16.msrb.mxu0 %v4308_v24  ;;  %v3733_v22 = vld [vmem:[#allocation13 + $0xa8] sm:$0xf0]  ;;  %v3928_v42 = vor.u32 %v5068_v28, %v3925_v29  ;;  %v5257_v28 = vld [vmem:[#allocation13 + $0x7ec] sm:$0xf0] }
 0x16a   :  { %v5180_v24 = vld [vmem:[#allocation13 + $0x58c] sm:$0xf]  ;;  %v3736_v34 = vor.u32 %v5020_v21, %v3733_v22 }
 0x16b   :  { %2470 = vmatpush.bf16.msrb.mxu3 %v4120_v19  ;;  %2448 = vmatpush.bf16.msrb.mxu1 %v4500_v30  ;;  %v3768_v19 = vor.u32 %v5028_v8, %v3765_v9  ;;  %v5228_v30 = vld [vmem:[#allocation13 + $0x70c] sm:$0xf] }
 0x16c   :  { %2386 = vmatmul.bf16.vlgmr.msra.gmra.mxu0 %v5738_v45  ;;  %2412 = vmatmul.bf16.vlgmr.msra.gmra.mxu2 %v5729_v55  ;;  %v3701_v39 = vld [vmem:[#allocation13 + $0x68] sm:$0xf0]  ;;  %v4568_v43 = vor.u32 %v5228_v30, %v4565_v31 }
 0x16d   :  { %2456 = vmatpush.bf16.msrb.mxu2 %v3896_v27  ;;  %2434 = vmatpush.bf16.msrb.mxu0 %v4276_v38  ;;  %v4600_v27 = vor.u32 %v5236_v17, %v4597_v18  ;;  %v5012_v38 = vld [vmem:[#allocation13 + $0x4c] sm:$0xf]  ;;  %v3835_v18 = vld [vmem:[#allocation13 + $0x150] sm:$0xf] }
 0x16e   :  { %v5172_v40 = vld [vmem:[#allocation13 + $0x54c] sm:$0xf] }
 0x16f   :  { %2471 = vmatpush.bf16.msrb.mxu3 %v4088_v35  ;;  %2449 = vmatpush.bf16.msrb.mxu1 %v4468_v32  ;;  %v4376_v35 = vor.u32 %v5180_v24, %v4373_v25  ;;  %v4156_v32 = vor.u32 %v5129_v37, %v4155_v36  ;;  %v5220_v33 = vld [vmem:[#allocation13 + $0x6cc] sm:$0xf]  ;;  %v4027_v24 = vld [vmem:[#allocation13 + $0x2d0] sm:$0xf] }
 0x170   :  { %v4533_v46 = vld [vmem:[#allocation13 + $0x6e8] sm:$0xf0]  ;;  %v5041_v36 = vld [vmem:[#allocation13 + $0x12c] sm:$0xf0] }
 0x171   :  { %2457 = vmatpush.bf16.msrb.mxu2 %v3864_v41  ;;  %2435 = vmatpush.bf16.msrb.mxu0 %v4244_v51  ;;  %v4341_v41 = vld [vmem:[#allocation13 + $0x568] sm:$0xf0] }
 0x172   :  { %v4344_v48 = vor.u32 %v5172_v40, %v4341_v41  ;;  %v5004_v51 = vld [vmem:[#allocation13 + $0xc] sm:$0xf]  ;;  %v5089_v41 = vld [vmem:[#allocation13 + $0x2ac] sm:$0xf0] }
 0x173   :  { %2472 = vmatpush.bf16.msrb.mxu3 %v4056_v47  ;;  %2450 = vmatpush.bf16.msrb.mxu1 %v4436_v59  ;;  %v3704_v47 = vor.u32 %v5012_v38, %v3701_v39  ;;  %v3669_v52 = vld [vmem:[#allocation13 + $0x28] sm:$0xf0]  ;;  %v4124_v59 = vor.u32 %v5121_v50, %v4123_v49  ;;  %v3995_v39 = vld [vmem:[#allocation13 + $0x290] sm:$0xf] }
 0x174   :  { %v5164_v53 = vld [vmem:[#allocation13 + $0x50c] sm:$0xf]  ;;  %v4411_v49 = vld [vmem:[#allocation13 + $0x5d0] sm:$0xf] }
 0x175   :  { %2458 = vmatpush.bf16.msrb.mxu2 %v3832_v56  ;;  %2436 = vmatpush.bf16.msrb.mxu0 %v4212_v1  ;;  %v4309_v54 = vld [vmem:[#allocation13 + $0x528] sm:$0xf0]  ;;  %v4536_v56 = vor.u32 %v5220_v33, %v4533_v46  ;;  %v5113_v1 = vld [vmem:[#allocation13 + $0x36c] sm:$0xf0] }
 0x176   :  { %2451 = vmatmul.bf16.vlgmr.msrb.gmra.mxu1 %v5734_v23  ;;  %v5212_v60 = vld [vmem:[#allocation13 + $0x68c] sm:$0xf]  ;;  %v4092_v8 = vor.u32 %v5113_v1, %v4091_v0  ;;  %v5193_v50 = vld [vmem:[#allocation13 + $0x5ec] sm:$0xf0] }
 0x177   :  { %2473 = vmatpush.bf16.msrb.mxu3 %v4024_v62  ;;  %2495 = vmatpush.bf16.msra.mxu1 %v4664_v63  ;;  %v4501_v61 = vld [vmem:[#allocation13 + $0x6a8] sm:$0xf0]  ;;  %v3672_v62 = vor.u32 %v5004_v51, %v3669_v52  ;;  %v4312_v63 = vor.u32 %v5164_v53, %v4309_v54  ;;  %v3996_v51 = vor.u32 %v5089_v41, %v3995_v39  ;;  %v3963_v54 = vld [vmem:[#allocation13 + $0x250] sm:$0xf]  ;;  %v5109_v39 = vld [vmem:[#allocation13 + $0x354] sm:$0xf] }
 0x178   :  { %v5156_v3 = vld [vmem:[#allocation13 + $0x4cc] sm:$0xf]  ;;  %v4412_v58 = vor.u32 %v5193_v50, %v4411_v49  ;;  %v5185_v0 = vld [vmem:[#allocation13 + $0x5ac] sm:$0xf0]  ;;  %v4093_v41 = vld [vmem:[#allocation13 + $0x370] sm:$0xf0] }
 0x179   :  { %2459 = vmatpush.bf16.msrb.mxu2 %v3800_v5  ;;  %2437 = vmatpush.bf16.msrb.mxu0 %v4180_v15  ;;  %v4277_v4 = vld [vmem:[#allocation13 + $0x4e8] sm:$0xf0]  ;;  %v4504_v5 = vor.u32 %v5212_v60, %v4501_v61  ;;  %v5241_v60 = vld [vmem:[#allocation13 + $0x76c] sm:$0xf0] }
 0x17a   :  { %v5204_v9 = vld [vmem:[#allocation13 + $0x64c] sm:$0xf]  ;;  %v4280_v11 = vor.u32 %v5156_v3, %v4277_v4  ;;  %v3739_v61 = vld [vmem:[#allocation13 + $0x90] sm:$0xf] }
 0x17b   :  { %2474 = vmatpush.bf16.msrb.mxu3 %v3992_v12  ;;  %2496 = vmatpush.bf16.msra.mxu1 %v4632_v13  ;;  %v4469_v10 = vld [vmem:[#allocation13 + $0x668] sm:$0xf0]  ;;  %v4059_v12 = vld [vmem:[#allocation13 + $0x310] sm:$0xf] }
 0x17c   :  { %2438 = vmatmul.bf16.vlgmr.msrb.gmra.mxu0 %v5738_v45  ;;  %v5105_v13 = vld [vmem:[#allocation13 + $0x32c] sm:$0xf0]  ;;  %v5148_v15 = vld [vmem:[#allocation13 + $0x48c] sm:$0xf]  ;;  %v4472_v17 = vor.u32 %v5204_v9, %v4469_v10  ;;  %v5125_v9 = vld [vmem:[#allocation13 + $0x3d4] sm:$0xf] }
 0x17d   :  { %2460 = vmatpush.bf16.msrb.mxu2 %v3768_v19  ;;  %2482 = vmatpush.bf16.msra.mxu0 %v4408_v20  ;;  %v4245_v16 = vld [vmem:[#allocation13 + $0x4a8] sm:$0xf0]  ;;  %v5049_v19 = vld [vmem:[#allocation13 + $0x16c] sm:$0xf0]  ;;  %v4060_v20 = vor.u32 %v5105_v13, %v4059_v12  ;;  %v4157_v10 = vld [vmem:[#allocation13 + $0x3f0] sm:$0xf0] }
 0x17e   :  { %v5196_v21 = vld [vmem:[#allocation13 + $0x60c] sm:$0xf]  ;;  %v4248_v25 = vor.u32 %v5148_v15, %v4245_v16  ;;  %v3836_v29 = vor.u32 %v5049_v19, %v3835_v18  ;;  %v5073_v4 = vld [vmem:[#allocation13 + $0x22c] sm:$0xf0] }
 0x17f   :  { %2475 = vmatpush.bf16.msrb.mxu3 %v3960_v26  ;;  %2497 = vmatpush.bf16.msra.mxu1 %v4600_v27  ;;  %v4437_v22 = vld [vmem:[#allocation13 + $0x628] sm:$0xf0]  ;;  %v5097_v26 = vld [vmem:[#allocation13 + $0x2ec] sm:$0xf0] }
 0x180   :  { %v4667_v27 = vld [vmem:[#allocation13 + $0x7d0] sm:$0xf]  ;;  %v5140_v30 = vld [vmem:[#allocation13 + $0x44c] sm:$0xf]  ;;  %v4028_v37 = vor.u32 %v5097_v26, %v4027_v24  ;;  %v4125_v24 = vld [vmem:[#allocation13 + $0x3b0] sm:$0xf0] }
 0x181   :  { %2461 = vmatpush.bf16.msrb.mxu2 %v3736_v34  ;;  %2483 = vmatpush.bf16.msra.mxu0 %v4376_v35  ;;  %v4213_v31 = vld [vmem:[#allocation13 + $0x468] sm:$0xf0]  ;;  %v4440_v34 = vor.u32 %v5196_v21, %v4437_v22  ;;  %v3803_v35 = vld [vmem:[#allocation13 + $0x110] sm:$0xf]  ;;  %v4668_v38 = vor.u32 %v5257_v28, %v4667_v27  ;;  %v5117_v22 = vld [vmem:[#allocation13 + $0x394] sm:$0xf] }
 0x182   :  { %v4216_v40 = vor.u32 %v5140_v30, %v4213_v31  ;;  %v5132_v33 = vld [vmem:[#allocation13 + $0x40c] sm:$0xf]  ;;  %v5017_v12 = vld [vmem:[#allocation13 + $0x6c] sm:$0xf0]  ;;  %v3901_v30 = vld [vmem:[#allocation13 + $0x1f0] sm:$0xf0] }
 0x183   :  { %2476 = vmatpush.bf16.msrb.mxu3 %v3928_v42  ;;  %2498 = vmatpush.bf16.msra.mxu1 %v4568_v43  ;;  %v4635_v42 = vld [vmem:[#allocation13 + $0x790] sm:$0xf]  ;;  %v4181_v46 = vld [vmem:[#allocation13 + $0x428] sm:$0xf0] }
 0x184   :  { %v5249_v43 = vld [vmem:[#allocation13 + $0x7ac] sm:$0xf0]  ;;  %v4184_v53 = vor.u32 %v5132_v33, %v4181_v46  ;;  %v3869_v33 = vld [vmem:[#allocation13 + $0x1b0] sm:$0xf0] }
 0x185   :  { %2462 = vmatpush.bf16.msrb.mxu2 %v3704_v47  ;;  %2484 = vmatpush.bf16.msra.mxu0 %v4344_v48  ;;  %v3771_v47 = vld [vmem:[#allocation13 + $0xd0] sm:$0xf]  ;;  %v4636_v52 = vor.u32 %v5249_v43, %v4635_v42 }
 0x186   :  { %2477 = vmatmul.bf16.vlgmr.msrb.gmra.mxu3 %v5726_v44  ;;  %v5033_v48 = vld [vmem:[#allocation13 + $0xec] sm:$0xf0] }
 0x187   :  { %2521 = vmatpush.bf16.msra.mxu3 %v4156_v32  ;;  %2499 = vmatpush.bf16.msra.mxu1 %v4536_v56  ;;  %v3804_v32 = vor.u32 %v5041_v36, %v3803_v35  ;;  %v5081_v56 = vld [vmem:[#allocation13 + $0x26c] sm:$0xf0]  ;;  %v3772_v57 = vor.u32 %v5033_v48, %v3771_v47  ;;  %v4096_v47 = vor.u32 %v5109_v39, %v4093_v41  ;;  %v4381_v39 = vld [vmem:[#allocation13 + $0x5b0] sm:$0xf0] }
 0x188   :  { %v3964_v1 = vor.u32 %v5081_v56, %v3963_v54  ;;  %v4347_v13 = vld [vmem:[#allocation13 + $0x550] sm:$0xf]  ;;  %v5069_v41 = vld [vmem:[#allocation13 + $0x214] sm:$0xf] }
 0x189   :  { %2463 = vmatpush.bf16.msrb.mxu2 %v3672_v62  ;;  %2485 = vmatpush.bf16.msra.mxu0 %v4312_v63  ;;  %v5025_v62 = vld [vmem:[#allocation13 + $0xac] sm:$0xf0] }
 0x18a   :  { %v4379_v63 = vld [vmem:[#allocation13 + $0x590] sm:$0xf]  ;;  %v3740_v7 = vor.u32 %v5025_v62, %v3739_v61 }
 0x18b   :  { %2522 = vmatpush.bf16.msra.mxu3 %v4124_v59  ;;  %2500 = vmatpush.bf16.msra.mxu1 %v4504_v5  ;;  %v4603_v59 = vld [vmem:[#allocation13 + $0x750] sm:$0xf] }
 0x18c   :  { %2464 = vmatmul.bf16.vlgmr.msrb.gmra.mxu2 %v5729_v55  ;;  %v4604_v3 = vor.u32 %v5241_v60, %v4603_v59  ;;  %v4571_v5 = vld [vmem:[#allocation13 + $0x710] sm:$0xf] }
 0x18d   :  { %2508 = vmatpush.bf16.msra.mxu2 %v3900_v2  ;;  %2486 = vmatpush.bf16.msra.mxu0 %v4280_v11  ;;  %v3931_v2 = vld [vmem:[#allocation13 + $0x210] sm:$0xf]  ;;  %v4572_v16 = vor.u32 %v5233_v6, %v4571_v5 }
 0x18e   :  { %v3707_v11 = vld [vmem:[#allocation13 + $0x50] sm:$0xf]  ;;  %v3932_v15 = vor.u32 %v5073_v4, %v3931_v2  ;;  %v4669_v4 = vld [vmem:[#allocation13 + $0x7f0] sm:$0xf0] }
 0x18f   :  { %2523 = vmatpush.bf16.msra.mxu3 %v4092_v8  ;;  %2501 = vmatpush.bf16.msra.mxu1 %v4472_v17  ;;  %v4380_v8 = vor.u32 %v5185_v0, %v4379_v63  ;;  %v4160_v17 = vor.u32 %v5125_v9, %v4157_v10  ;;  %v4539_v18 = vld [vmem:[#allocation13 + $0x6d0] sm:$0xf]  ;;  %v5093_v0 = vld [vmem:[#allocation13 + $0x2d4] sm:$0xf] }
 0x190   :  { %v5225_v19 = vld [vmem:[#allocation13 + $0x6ec] sm:$0xf0] }
 0x191   :  { %2509 = vmatpush.bf16.msra.mxu2 %v3868_v14  ;;  %2487 = vmatpush.bf16.msra.mxu0 %v4248_v25  ;;  %v5177_v14 = vld [vmem:[#allocation13 + $0x56c] sm:$0xf0]  ;;  %v4540_v31 = vor.u32 %v5225_v19, %v4539_v18 }
 0x192   :  { %v4348_v21 = vor.u32 %v5177_v14, %v4347_v13  ;;  %v3675_v25 = vld [vmem:[#allocation13 + $0x10] sm:$0xf]  ;;  %v3997_v13 = vld [vmem:[#allocation13 + $0x2b0] sm:$0xf0] }
 0x193   :  { %2524 = vmatpush.bf16.msra.mxu3 %v4060_v20  ;;  %2502 = vmatpush.bf16.msra.mxu1 %v4440_v34  ;;  %v3708_v20 = vor.u32 %v5017_v12, %v3707_v11  ;;  %v5009_v26 = vld [vmem:[#allocation13 + $0x2c] sm:$0xf0]  ;;  %v4128_v34 = vor.u32 %v5117_v22, %v4125_v24  ;;  %v5085_v12 = vld [vmem:[#allocation13 + $0x294] sm:$0xf] }
 0x194   :  { %v4315_v27 = vld [vmem:[#allocation13 + $0x510] sm:$0xf]  ;;  %v3676_v35 = vor.u32 %v5009_v26, %v3675_v25  ;;  %v5189_v22 = vld [vmem:[#allocation13 + $0x5d4] sm:$0xf]  ;;  %v4000_v25 = vor.u32 %v5085_v12, %v3997_v13  ;;  %v4099_v12 = vld [vmem:[#allocation13 + $0x358] sm:$0xf] }
 0x195   :  { %2510 = vmatpush.bf16.msra.mxu2 %v3836_v29  ;;  %2488 = vmatpush.bf16.msra.mxu0 %v4216_v40  ;;  %v5169_v28 = vld [vmem:[#allocation13 + $0x52c] sm:$0xf0]  ;;  %v5061_v29 = vld [vmem:[#allocation13 + $0x1d4] sm:$0xf] }
 0x196   :  { %2503 = vmatmul.bf16.vlgmr.msra.gmra.mxu1 %v5734_v23  ;;  %v4316_v36 = vor.u32 %v5169_v28, %v4315_v27  ;;  %v3904_v40 = vor.u32 %v5061_v29, %v3901_v30  ;;  %v4283_v42 = vld [vmem:[#allocation13 + $0x4d0] sm:$0xf]  ;;  %v4413_v24 = vld [vmem:[#allocation13 + $0x5f0] sm:$0xf0] }
 0x197   :  { %2525 = vmatpush.bf16.msra.mxu3 %v4028_v37  ;;  %2547 = vmatpush.bf16.msrb.mxu1 %v4668_v38  ;;  %v4507_v37 = vld [vmem:[#allocation13 + $0x690] sm:$0xf]  ;;  %v5077_v29 = vld [vmem:[#allocation13 + $0x254] sm:$0xf] }
 0x198   :  { %v5217_v38 = vld [vmem:[#allocation13 + $0x6ac] sm:$0xf0]  ;;  %v3965_v30 = vld [vmem:[#allocation13 + $0x270] sm:$0xf0] }
 0x199   :  { %2511 = vmatpush.bf16.msra.mxu2 %v3804_v32  ;;  %2489 = vmatpush.bf16.msra.mxu0 %v4184_v53  ;;  %v5161_v43 = vld [vmem:[#allocation13 + $0x4ec] sm:$0xf0]  ;;  %v5053_v32 = vld [vmem:[#allocation13 + $0x194] sm:$0xf]  ;;  %v4508_v46 = vor.u32 %v5217_v38, %v4507_v37 }
 0x19a   :  { %v4284_v48 = vor.u32 %v5161_v43, %v4283_v42  ;;  %v4475_v49 = vld [vmem:[#allocation13 + $0x650] sm:$0xf]  ;;  %v4061_v53 = vld [vmem:[#allocation13 + $0x330] sm:$0xf0] }
 0x19b   :  { %2526 = vmatpush.bf16.msra.mxu3 %v3996_v51  ;;  %2548 = vmatpush.bf16.msrb.mxu1 %v4636_v52  ;;  %v5209_v50 = vld [vmem:[#allocation13 + $0x66c] sm:$0xf0]  ;;  %v5101_v51 = vld [vmem:[#allocation13 + $0x314] sm:$0xf]  ;;  %v3872_v52 = vor.u32 %v5053_v32, %v3869_v33 }
 0x19c   :  { %2490 = vmatmul.bf16.vlgmr.msra.gmra.mxu0 %v5738_v45  ;;  %v4251_v54 = vld [vmem:[#allocation13 + $0x490] sm:$0xf]  ;;  %v4476_v59 = vor.u32 %v5209_v50, %v4475_v49  ;;  %v4064_v61 = vor.u32 %v5101_v51, %v4061_v53  ;;  %v3741_v37 = vld [vmem:[#allocation13 + $0xb0] sm:$0xf0]  ;;  %v5130_v49 = vld [vmem:[#allocation13 + $0x3f4] sm:$0xf0] }
 0x19d   :  { %2512 = vmatpush.bf16.msra.mxu2 %v3772_v57  ;;  %2534 = vmatpush.bf16.msrb.mxu0 %v4412_v58  ;;  %v5153_v56 = vld [vmem:[#allocation13 + $0x4ac] sm:$0xf0]  ;;  %v5045_v57 = vld [vmem:[#allocation13 + $0x154] sm:$0xf] }
 0x19e   :  { %v3837_v58 = vld [vmem:[#allocation13 + $0x170] sm:$0xf0]  ;;  %v4443_v60 = vld [vmem:[#allocation13 + $0x610] sm:$0xf]  ;;  %v4252_v62 = vor.u32 %v5153_v56, %v4251_v54 }
 0x19f   :  { %2527 = vmatpush.bf16.msra.mxu3 %v3964_v1  ;;  %2549 = vmatpush.bf16.msrb.mxu1 %v4604_v3  ;;  %v5201_v63 = vld [vmem:[#allocation13 + $0x62c] sm:$0xf0]  ;;  %v4029_v1 = vld [vmem:[#allocation13 + $0x2f0] sm:$0xf0]  ;;  %v3840_v2 = vor.u32 %v5045_v57, %v3837_v58 }
 0x1a0   :  { %v5253_v3 = vld [vmem:[#allocation13 + $0x7d4] sm:$0xf]  ;;  %v4219_v5 = vld [vmem:[#allocation13 + $0x450] sm:$0xf]  ;;  %v4444_v9 = vor.u32 %v5201_v63, %v4443_v60  ;;  %v4032_v10 = vor.u32 %v5093_v0, %v4029_v1  ;;  %v5122_v63 = vld [vmem:[#allocation13 + $0x3b4] sm:$0xf0] }
 0x1a1   :  { %2513 = vmatpush.bf16.msra.mxu2 %v3740_v7  ;;  %2535 = vmatpush.bf16.msrb.mxu0 %v4380_v8  ;;  %v5145_v6 = vld [vmem:[#allocation13 + $0x46c] sm:$0xf0]  ;;  %v5037_v7 = vld [vmem:[#allocation13 + $0x114] sm:$0xf]  ;;  %v4672_v11 = vor.u32 %v5253_v3, %v4669_v4  ;;  %v3907_v4 = vld [vmem:[#allocation13 + $0x1d8] sm:$0xf] }
 0x1a2   :  { %v3805_v8 = vld [vmem:[#allocation13 + $0x130] sm:$0xf0]  ;;  %v4220_v14 = vor.u32 %v5145_v6, %v4219_v5  ;;  %v4187_v18 = vld [vmem:[#allocation13 + $0x410] sm:$0xf]  ;;  %v5066_v5 = vld [vmem:[#allocation13 + $0x1f4] sm:$0xf0] }
 0x1a3   :  { %2528 = vmatpush.bf16.msra.mxu3 %v3932_v15  ;;  %2550 = vmatpush.bf16.msrb.mxu1 %v4572_v16  ;;  %v3808_v15 = vor.u32 %v5037_v7, %v3805_v8  ;;  %v5245_v16 = vld [vmem:[#allocation13 + $0x794] sm:$0xf]  ;;  %v5137_v19 = vld [vmem:[#allocation13 + $0x42c] sm:$0xf0]  ;;  %v3908_v13 = vor.u32 %v5066_v5, %v3907_v4 }
 0x1a4   :  { %v4188_v27 = vor.u32 %v5137_v19, %v4187_v18  ;;  %v5181_v38 = vld [vmem:[#allocation13 + $0x594] sm:$0xf]  ;;  %v5058_v18 = vld [vmem:[#allocation13 + $0x1b4] sm:$0xf0] }
 0x1a5   :  { %2514 = vmatpush.bf16.msra.mxu2 %v3708_v20  ;;  %2536 = vmatpush.bf16.msrb.mxu0 %v4348_v21  ;;  %v5029_v20 = vld [vmem:[#allocation13 + $0xd4] sm:$0xf] }
 0x1a6   :  { %2529 = vmatmul.bf16.vlgmr.msra.gmra.mxu3 %v5726_v44  ;;  %v3773_v21 = vld [vmem:[#allocation13 + $0xf0] sm:$0xf0] }
 0x1a7   :  { %2573 = vmatpush.bf16.msrb.mxu3 %v4160_v17  ;;  %2551 = vmatpush.bf16.msrb.mxu1 %v4540_v31  ;;  %v4637_v17 = vld [vmem:[#allocation13 + $0x7b0] sm:$0xf0]  ;;  %v3776_v28 = vor.u32 %v5029_v20, %v3773_v21 }
 0x1a8   :  { %v4640_v26 = vor.u32 %v5245_v16, %v4637_v17  ;;  %v5237_v31 = vld [vmem:[#allocation13 + $0x754] sm:$0xf]  ;;  %v3875_v17 = vld [vmem:[#allocation13 + $0x198] sm:$0xf] }
 0x1a9   :  { %2515 = vmatpush.bf16.msra.mxu2 %v3676_v35  ;;  %2537 = vmatpush.bf16.msrb.mxu0 %v4316_v36  ;;  %v4605_v35 = vld [vmem:[#allocation13 + $0x770] sm:$0xf0] }
 0x1aa   :  { %v5021_v36 = vld [vmem:[#allocation13 + $0x94] sm:$0xf]  ;;  %v4608_v42 = vor.u32 %v5237_v31, %v4605_v35  ;;  %v5050_v31 = vld [vmem:[#allocation13 + $0x174] sm:$0xf0] }
 0x1ab   :  { %2574 = vmatpush.bf16.msrb.mxu3 %v4128_v34  ;;  %2552 = vmatpush.bf16.msrb.mxu1 %v4508_v46  ;;  %v4416_v34 = vor.u32 %v5189_v22, %v4413_v24  ;;  %v3744_v43 = vor.u32 %v5021_v36, %v3741_v37  ;;  %v3933_v32 = vld [vmem:[#allocation13 + $0x230] sm:$0xf0] }
 0x1ac   :  { %2516 = vmatmul.bf16.vlgmr.msra.gmra.mxu2 %v5729_v55  ;;  %v5229_v33 = vld [vmem:[#allocation13 + $0x714] sm:$0xf]  ;;  %v3936_v54 = vor.u32 %v5069_v41, %v3933_v32 }
 0x1ad   :  { %2560 = vmatpush.bf16.msrb.mxu2 %v3904_v40  ;;  %2538 = vmatpush.bf16.msrb.mxu0 %v4284_v48  ;;  %v3968_v40 = vor.u32 %v5077_v29, %v3965_v30  ;;  %v4573_v46 = vld [vmem:[#allocation13 + $0x730] sm:$0xf0]  ;;  %v4163_v48 = vld [vmem:[#allocation13 + $0x3d8] sm:$0xf] }
 0x1ae   :  { %v5013_v50 = vld [vmem:[#allocation13 + $0x54] sm:$0xf]  ;;  %v4576_v56 = vor.u32 %v5229_v33, %v4573_v46  ;;  %v4164_v57 = vor.u32 %v5130_v49, %v4163_v48  ;;  %v3843_v30 = vld [vmem:[#allocation13 + $0x158] sm:$0xf]  ;;  %v5758_v49 = vld [vmem:[#allocation14] sm:$0xff] }
 0x1af   :  { %2575 = vmatpush.bf16.msrb.mxu3 %v4096_v47  ;;  %2553 = vmatpush.bf16.msrb.mxu1 %v4476_v59  ;;  %v4384_v47 = vor.u32 %v5181_v38, %v4381_v39  ;;  %v3709_v51 = vld [vmem:[#allocation13 + $0x70] sm:$0xf0]  ;;  %v4035_v39 = vld [vmem:[#allocation13 + $0x2d8] sm:$0xf]  ;;  %v3844_v41 = vor.u32 %v5050_v31, %v3843_v30  ;;  %v5126_v30 = vld [vmem:[#allocation13 + $0x3dc] sm:$0xf] }
 0x1b0   :  { %v4349_v53 = vld [vmem:[#allocation13 + $0x570] sm:$0xf0]  ;;  %v3712_v60 = vor.u32 %v5013_v50, %v3709_v51  ;;  %v3811_v46 = vld [vmem:[#allocation13 + $0x118] sm:$0xf]  ;;  %v4165_v31 = vld [vmem:[#allocation13 + $0x3f8] sm:$0xf0] }
 0x1b1   :  { %2561 = vmatpush.bf16.msrb.mxu2 %v3872_v52  ;;  %2539 = vmatpush.bf16.msrb.mxu0 %v4252_v62  ;;  %v5173_v52 = vld [vmem:[#allocation13 + $0x554] sm:$0xf]  ;;  %v4131_v62 = vld [vmem:[#allocation13 + $0x398] sm:$0xf] }
 0x1b2   :  { %v5221_v58 = vld [vmem:[#allocation13 + $0x6d4] sm:$0xf]  ;;  %v4132_v7 = vor.u32 %v5122_v63, %v4131_v62  ;;  %v1004_v62 = vperm.slane %v5758_v49, 0  ;;  %v3779_v63 = vld [vmem:[#allocation13 + $0xd8] sm:$0xf] }
 0x1b3   :  { %2576 = vmatpush.bf16.msrb.mxu3 %v4064_v61  ;;  %2554 = vmatpush.bf16.msrb.mxu1 %v4444_v9  ;;  %v4541_v59 = vld [vmem:[#allocation13 + $0x6f0] sm:$0xf0]  ;;  %v4352_v61 = vor.u32 %v5173_v52, %v4349_v53  ;;  %v4003_v53 = vld [vmem:[#allocation13 + $0x298] sm:$0xf] }
 0x1b4   :  { %v5005_v0 = vld [vmem:[#allocation13 + $0x14] sm:$0xf]  ;;  %v4544_v6 = vor.u32 %v5221_v58, %v4541_v59  ;;  %v5250_v59 = vld [vmem:[#allocation13 + $0x7b4] sm:$0xf0] }
 0x1b5   :  { %2562 = vmatpush.bf16.msrb.mxu2 %v3840_v2  ;;  %2540 = vmatpush.bf16.msrb.mxu0 %v4220_v14  ;;  %v3677_v1 = vld [vmem:[#allocation13 + $0x30] sm:$0xf0]  ;;  %v5114_v14 = vld [vmem:[#allocation13 + $0x374] sm:$0xf0] }
 0x1b6   :  { %2555 = vmatmul.bf16.vlgmr.msrb.gmra.mxu1 %v5734_v23  ;;  %v5165_v2 = vld [vmem:[#allocation13 + $0x514] sm:$0xf]  ;;  %v3680_v8 = vor.u32 %v5005_v0, %v3677_v1  ;;  %v4100_v20 = vor.u32 %v5114_v14, %v4099_v12  ;;  %v5034_v0 = vld [vmem:[#allocation13 + $0xf4] sm:$0xf0] }
 0x1b7   :  { %2577 = vmatpush.bf16.msrb.mxu3 %v4032_v10  ;;  %2599 = vmatpush.bf16.msra.mxu1 %v4672_v11  ;;  %v4317_v3 = vld [vmem:[#allocation13 + $0x530] sm:$0xf0]  ;;  %v4419_v1 = vld [vmem:[#allocation13 + $0x5d8] sm:$0xf] }
 0x1b8   :  { %v4320_v9 = vor.u32 %v5165_v2, %v4317_v3  ;;  %v5213_v10 = vld [vmem:[#allocation13 + $0x694] sm:$0xf]  ;;  %v5194_v2 = vld [vmem:[#allocation13 + $0x5f4] sm:$0xf0] }
 0x1b9   :  { %2563 = vmatpush.bf16.msrb.mxu2 %v3808_v15  ;;  %2541 = vmatpush.bf16.msrb.mxu0 %v4188_v27  ;;  %v4509_v11 = vld [vmem:[#allocation13 + $0x6b0] sm:$0xf0]  ;;  %v5106_v27 = vld [vmem:[#allocation13 + $0x334] sm:$0xf0]  ;;  %v4420_v12 = vor.u32 %v5194_v2, %v4419_v1  ;;  %v5110_v2 = vld [vmem:[#allocation13 + $0x35c] sm:$0xf] }
 0x1ba   :  { %v5157_v15 = vld [vmem:[#allocation13 + $0x4d4] sm:$0xf]  ;;  %v4512_v19 = vor.u32 %v5213_v10, %v4509_v11  ;;  %v4611_v10 = vld [vmem:[#allocation13 + $0x758] sm:$0xf] }
 0x1bb   :  { %2578 = vmatpush.bf16.msrb.mxu3 %v4000_v25  ;;  %2600 = vmatpush.bf16.msra.mxu1 %v4640_v26  ;;  %v4285_v16 = vld [vmem:[#allocation13 + $0x4f0] sm:$0xf0]  ;;  %v4067_v25 = vld [vmem:[#allocation13 + $0x318] sm:$0xf]  ;;  %v3876_v26 = vor.u32 %v5058_v18, %v3875_v17 }
 0x1bc   :  { %2542 = vmatmul.bf16.vlgmr.msrb.gmra.mxu0 %v5738_v45  ;;  %v4288_v21 = vor.u32 %v5157_v15, %v4285_v16  ;;  %v5205_v22 = vld [vmem:[#allocation13 + $0x654] sm:$0xf]  ;;  %v4068_v36 = vor.u32 %v5106_v27, %v4067_v25  ;;  %v3747_v14 = vld [vmem:[#allocation13 + $0x98] sm:$0xf] }
 0x1bd   :  { %2564 = vmatpush.bf16.msrb.mxu2 %v3776_v28  ;;  %2586 = vmatpush.bf16.msra.mxu0 %v4416_v34  ;;  %v4477_v24 = vld [vmem:[#allocation13 + $0x670] sm:$0xf0]  ;;  %v5026_v15 = vld [vmem:[#allocation13 + $0xb4] sm:$0xf0] }
 0x1be   :  { %v5149_v28 = vld [vmem:[#allocation13 + $0x494] sm:$0xf]  ;;  %v4480_v34 = vor.u32 %v5205_v22, %v4477_v24  ;;  %v4387_v16 = vld [vmem:[#allocation13 + $0x598] sm:$0xf]  ;;  %v3748_v24 = vor.u32 %v5026_v15, %v3747_v14 }
 0x1bf   :  { %2579 = vmatpush.bf16.msrb.mxu3 %v3968_v40  ;;  %2601 = vmatpush.bf16.msra.mxu1 %v4608_v42  ;;  %v4253_v29 = vld [vmem:[#allocation13 + $0x4b0] sm:$0xf0]  ;;  %v5098_v40 = vld [vmem:[#allocation13 + $0x2f4] sm:$0xf0] }
 0x1c0   :  { %v5197_v35 = vld [vmem:[#allocation13 + $0x614] sm:$0xf]  ;;  %v4256_v37 = vor.u32 %v5149_v28, %v4253_v29  ;;  %v4675_v42 = vld [vmem:[#allocation13 + $0x7d8] sm:$0xf]  ;;  %v4036_v51 = vor.u32 %v5098_v40, %v4035_v39 }
 0x1c1   :  { %2565 = vmatpush.bf16.msrb.mxu2 %v3744_v43  ;;  %2587 = vmatpush.bf16.msra.mxu0 %v4384_v47  ;;  %v4445_v38 = vld [vmem:[#allocation13 + $0x630] sm:$0xf0]  ;;  %v5258_v43 = vld [vmem:[#allocation13 + $0x7f4] sm:$0xf0] }
 0x1c2   :  { %v5141_v32 = vld [vmem:[#allocation13 + $0x454] sm:$0xf]  ;;  %v5042_v47 = vld [vmem:[#allocation13 + $0x134] sm:$0xf0]  ;;  %v4448_v48 = vor.u32 %v5197_v35, %v4445_v38  ;;  %v4676_v52 = vor.u32 %v5258_v43, %v4675_v42 }
 0x1c3   :  { %2580 = vmatpush.bf16.msrb.mxu3 %v3936_v54  ;;  %2602 = vmatpush.bf16.msra.mxu1 %v4576_v56  ;;  %v4221_v33 = vld [vmem:[#allocation13 + $0x470] sm:$0xf0]  ;;  %v5090_v54 = vld [vmem:[#allocation13 + $0x2b4] sm:$0xf0]  ;;  %v3812_v58 = vor.u32 %v5042_v47, %v3811_v46  ;;  %v5118_v46 = vld [vmem:[#allocation13 + $0x39c] sm:$0xf] }
 0x1c4   :  { %v4643_v56 = vld [vmem:[#allocation13 + $0x798] sm:$0xf]  ;;  %v4004_v3 = vor.u32 %v5090_v54, %v4003_v53  ;;  %v4133_v47 = vld [vmem:[#allocation13 + $0x3b8] sm:$0xf0] }
 0x1c5   :  { %2566 = vmatpush.bf16.msrb.mxu2 %v3712_v60  ;;  %2588 = vmatpush.bf16.msra.mxu0 %v4352_v61  ;;  %v5133_v60 = vld [vmem:[#allocation13 + $0x414] sm:$0xf]  ;;  %v4644_v4 = vor.u32 %v5250_v59, %v4643_v56  ;;  %v5186_v17 = vld [vmem:[#allocation13 + $0x5b4] sm:$0xf0]  ;;  %v5062_v56 = vld [vmem:[#allocation13 + $0x1dc] sm:$0xf] }
 0x1c6   :  { %2581 = vmatmul.bf16.vlgmr.msrb.gmra.mxu3 %v5726_v44  ;;  %v4189_v61 = vld [vmem:[#allocation13 + $0x430] sm:$0xf0]  ;;  %v5074_v25 = vld [vmem:[#allocation13 + $0x234] sm:$0xf0]  ;;  %v4388_v29 = vor.u32 %v5186_v17, %v4387_v16  ;;  %v5102_v16 = vld [vmem:[#allocation13 + $0x31c] sm:$0xf] }
 0x1c7   :  { %2625 = vmatpush.bf16.msra.mxu3 %v4164_v57  ;;  %2603 = vmatpush.bf16.msra.mxu1 %v4544_v6  ;;  %v4224_v57 = vor.u32 %v5141_v32, %v4221_v33  ;;  %v4192_v6 = vor.u32 %v5133_v60, %v4189_v61  ;;  %v5234_v27 = vld [vmem:[#allocation13 + $0x734] sm:$0xf0]  ;;  %v4136_v60 = vor.u32 %v5118_v46, %v4133_v47  ;;  %v5086_v47 = vld [vmem:[#allocation13 + $0x29c] sm:$0xf] }
 0x1c8   :  { %v5018_v35 = vld [vmem:[#allocation13 + $0x74] sm:$0xf0] }
 0x1c9   :  { %2567 = vmatpush.bf16.msrb.mxu2 %v3680_v8  ;;  %2589 = vmatpush.bf16.msra.mxu0 %v4320_v9  ;;  %v2322_v50 = vpop.f32.mrf.mxu3  ;;  %v3971_v8 = vld [vmem:[#allocation13 + $0x258] sm:$0xf] }
 0x1ca   :  { %v5082_v9 = vld [vmem:[#allocation13 + $0x274] sm:$0xf0] }
 0x1cb   :  { %2626 = vmatpush.bf16.msra.mxu3 %v4132_v7  ;;  %2604 = vmatpush.bf16.msra.mxu1 %v4512_v19  ;;  %v3780_v7 = vor.u32 %v5034_v0, %v3779_v63  ;;  %v3972_v19 = vor.u32 %v5082_v9, %v3971_v8  ;;  %v4547_v42 = vld [vmem:[#allocation13 + $0x6d8] sm:$0xf]  ;;  %v5054_v8 = vld [vmem:[#allocation13 + $0x19c] sm:$0xf] }
 0x1cc   :  { %2568 = vmatmul.bf16.vlgmr.msrb.gmra.mxu2 %v5729_v55  ;;  %v5226_v43 = vld [vmem:[#allocation13 + $0x6f4] sm:$0xf0]  ;;  %v3877_v9 = vld [vmem:[#allocation13 + $0x1b8] sm:$0xf0] }
 0x1cd   :  { %2612 = vmatpush.bf16.msra.mxu2 %v3908_v13  ;;  %2590 = vmatpush.bf16.msra.mxu0 %v4288_v21  ;;  %v5242_v13 = vld [vmem:[#allocation13 + $0x774] sm:$0xf0]  ;;  %v4548_v59 = vor.u32 %v5226_v43, %v4547_v42  ;;  %v3880_v17 = vor.u32 %v5054_v8, %v3877_v9  ;;  %v3813_v42 = vld [vmem:[#allocation13 + $0x138] sm:$0xf0] }
 0x1ce   :  { %v4612_v22 = vor.u32 %v5242_v13, %v4611_v10  ;;  %v4515_v0 = vld [vmem:[#allocation13 + $0x698] sm:$0xf]  ;;  %v5238_v8 = vld [vmem:[#allocation13 + $0x75c] sm:$0xf] }
 0x1cf   :  { %2627 = vmatpush.bf16.msra.mxu3 %v4100_v20  ;;  %2605 = vmatpush.bf16.msra.mxu1 %v4480_v34  ;;  %v2309_v5 = vpop.f32.mrf.mxu2  ;;  %v3939_v20 = vld [vmem:[#allocation13 + $0x218] sm:$0xf] }
 0x1d0   :  { %v2310_v11 = vadd.f32 %v2309_v5, %v1004_v62  ;;  %v3715_v34 = vld [vmem:[#allocation13 + $0x58] sm:$0xf]  ;;  %v3940_v38 = vor.u32 %v5074_v25, %v3939_v20  ;;  %v4101_v5 = vld [vmem:[#allocation13 + $0x378] sm:$0xf0] }
 0x1d1   :  { %2613 = vmatpush.bf16.msra.mxu2 %v3876_v26  ;;  %2591 = vmatpush.bf16.msra.mxu0 %v4256_v37  ;;  %v2324_v18 = vpop.f32.mrf.mxu3  ;;  %v4579_v26 = vld [vmem:[#allocation13 + $0x718] sm:$0xf]  ;;  %v3716_v32 = vor.u32 %v5018_v35, %v3715_v34  ;;  %v3845_v25 = vld [vmem:[#allocation13 + $0x178] sm:$0xf0] }
 0x1d2   :  { %v2323_v21 = vadd.f32 %v2322_v50, %v2310_v11  ;;  %v5178_v37 = vld [vmem:[#allocation13 + $0x574] sm:$0xf0]  ;;  %v4580_v39 = vor.u32 %v5234_v27, %v4579_v26  ;;  %v4069_v18 = vld [vmem:[#allocation13 + $0x338] sm:$0xf0] }
 0x1d3   :  { %2628 = vmatpush.bf16.msra.mxu3 %v4068_v36  ;;  %2606 = vmatpush.bf16.msra.mxu1 %v4448_v48  ;;  %v2348_v28 = vpop.f32.mrf.mxu1  ;;  %v4355_v36 = vld [vmem:[#allocation13 + $0x558] sm:$0xf]  ;;  %v5094_v34 = vld [vmem:[#allocation13 + $0x2dc] sm:$0xf] }
 0x1d4   :  { %v4356_v33 = vor.u32 %v5178_v37, %v4355_v36  ;;  %v3683_v48 = vld [vmem:[#allocation13 + $0x18] sm:$0xf]  ;;  %v4037_v35 = vld [vmem:[#allocation13 + $0x2f8] sm:$0xf0] }
 0x1d5   :  { %2614 = vmatpush.bf16.msra.mxu2 %v3844_v41  ;;  %2592 = vmatpush.bf16.msra.mxu0 %v4224_v57  ;;  %v4168_v41 = vor.u32 %v5126_v30, %v4165_v31  ;;  %v5010_v50 = vld [vmem:[#allocation13 + $0x34] sm:$0xf0]  ;;  %v3909_v57 = vld [vmem:[#allocation13 + $0x1f8] sm:$0xf0] }
 0x1d6   :  { %2607 = vmatmul.bf16.vlgmr.msra.gmra.mxu1 %v5734_v23  ;;  %v3684_v62 = vor.u32 %v5010_v50, %v3683_v48  ;;  %v5218_v1 = vld [vmem:[#allocation13 + $0x6b4] sm:$0xf0]  ;;  %v5254_v37 = vld [vmem:[#allocation13 + $0x7dc] sm:$0xf] }
 0x1d7   :  { %2629 = vmatpush.bf16.msra.mxu3 %v4036_v51  ;;  %2651 = vmatpush.bf16.msrb.mxu1 %v4676_v52  ;;  %v2311_v40 = vpop.f32.mrf.mxu2  ;;  %v4323_v51 = vld [vmem:[#allocation13 + $0x518] sm:$0xf]  ;;  %v4516_v10 = vor.u32 %v5218_v1, %v4515_v0  ;;  %v4005_v48 = vld [vmem:[#allocation13 + $0x2b8] sm:$0xf0] }
 0x1d8   :  { %v5170_v52 = vld [vmem:[#allocation13 + $0x534] sm:$0xf0]  ;;  %v4008_v1 = vor.u32 %v5086_v47, %v4005_v48 }
 0x1d9   :  { %2615 = vmatpush.bf16.msra.mxu2 %v3812_v58  ;;  %2593 = vmatpush.bf16.msra.mxu0 %v4192_v6  ;;  %v2335_v53 = vpop.f32.mrf.mxu0  ;;  %v5763_v54 = vpop.f32.mrf.mxu3  ;;  %v4324_v63 = vor.u32 %v5170_v52, %v4323_v51  ;;  %v4291_v6 = vld [vmem:[#allocation13 + $0x4d8] sm:$0xf]  ;;  %v5246_v52 = vld [vmem:[#allocation13 + $0x79c] sm:$0xf] }
 0x1da   :  { %v2336_v58 = vadd.f32 %v2335_v53, %v2323_v21  ;;  %v4483_v14 = vld [vmem:[#allocation13 + $0x658] sm:$0xf]  ;;  %v4645_v53 = vld [vmem:[#allocation13 + $0x7b8] sm:$0xf0] }
 0x1db   :  { %2630 = vmatpush.bf16.msra.mxu3 %v4004_v3  ;;  %2652 = vmatpush.bf16.msrb.mxu1 %v4644_v4  ;;  %v2350_v61 = vpop.f32.mrf.mxu1  ;;  %v3912_v4 = vor.u32 %v5062_v56, %v3909_v57  ;;  %v5210_v15 = vld [vmem:[#allocation13 + $0x674] sm:$0xf0] }
 0x1dc   :  { %2594 = vmatmul.bf16.vlgmr.msra.gmra.mxu0 %v5738_v45  ;;  %v5765_v3 = vadd.f32 %v2348_v28, %v2336_v58  ;;  %v5154_v20 = vld [vmem:[#allocation13 + $0x4b4] sm:$0xf0]  ;;  %v4484_v26 = vor.u32 %v5210_v15, %v4483_v14  ;;  %v3781_v61 = vld [vmem:[#allocation13 + $0xf8] sm:$0xf0] }
 0x1dd   :  { %2616 = vmatpush.bf16.msra.mxu2 %v3780_v7  ;;  %2638 = vmatpush.bf16.msrb.mxu0 %v4420_v12  ;;  %v5162_v7 = vld [vmem:[#allocation13 + $0x4f4] sm:$0xf0]  ;;  %v4104_v12 = vor.u32 %v5110_v2, %v4101_v5  ;;  %v4648_v2 = vor.u32 %v5246_v52, %v4645_v53  ;;  %v5182_v14 = vld [vmem:[#allocation13 + $0x59c] sm:$0xf] }
 0x1de   :  { %v4292_v13 = vor.u32 %v5162_v7, %v4291_v6  ;;  %v4451_v27 = vld [vmem:[#allocation13 + $0x618] sm:$0xf]  ;;  %v5078_v6 = vld [vmem:[#allocation13 + $0x25c] sm:$0xf] }
 0x1df   :  { %2631 = vmatpush.bf16.msra.mxu3 %v3972_v19  ;;  %2653 = vmatpush.bf16.msrb.mxu1 %v4612_v22  ;;  %v5768_v11 = vpop.f32.mrf.mxu2  ;;  %v4259_v19 = vld [vmem:[#allocation13 + $0x498] sm:$0xf]  ;;  %v3973_v7 = vld [vmem:[#allocation13 + $0x278] sm:$0xf0] }
 0x1e0   :  { %v4260_v30 = vor.u32 %v5154_v20, %v4259_v19  ;;  %v5202_v31 = vld [vmem:[#allocation13 + $0x634] sm:$0xf0]  ;;  %v4389_v15 = vld [vmem:[#allocation13 + $0x5b8] sm:$0xf0] }
 0x1e1   :  { %2617 = vmatpush.bf16.msra.mxu2 %v3748_v24  ;;  %2639 = vmatpush.bf16.msrb.mxu0 %v4388_v29  ;;  %v2337_v21 = vpop.f32.mrf.mxu0  ;;  %v2376_v22 = vpop.f32.mrf.mxu3  ;;  %v5046_v24 = vld [vmem:[#allocation13 + $0x15c] sm:$0xf]  ;;  %v4072_v29 = vor.u32 %v5102_v16, %v4069_v18  ;;  %v5146_v40 = vld [vmem:[#allocation13 + $0x474] sm:$0xf0]  ;;  %v4452_v43 = vor.u32 %v5202_v31, %v4451_v27  ;;  %v3976_v16 = vor.u32 %v5078_v6, %v3973_v7 }
 0x1e2   :  { %v3848_v36 = vor.u32 %v5046_v24, %v3845_v25  ;;  %v4195_v56 = vld [vmem:[#allocation13 + $0x418] sm:$0xf]  ;;  %v5070_v20 = vld [vmem:[#allocation13 + $0x21c] sm:$0xf]  ;;  %v4392_v25 = vor.u32 %v5182_v14, %v4389_v15 }
 0x1e3   :  { %2632 = vmatpush.bf16.msra.mxu3 %v3940_v38  ;;  %2654 = vmatpush.bf16.msrb.mxu1 %v4580_v39  ;;  %v5771_v28 = vpop.f32.mrf.mxu1  ;;  %v4677_v38 = vld [vmem:[#allocation13 + $0x7f8] sm:$0xf0]  ;;  %v4227_v39 = vld [vmem:[#allocation13 + $0x458] sm:$0xf] }
 0x1e4   :  { %v4680_v46 = vor.u32 %v5254_v37, %v4677_v38  ;;  %v4228_v50 = vor.u32 %v5146_v40, %v4227_v39  ;;  %v3941_v21 = vld [vmem:[#allocation13 + $0x238] sm:$0xf0]  ;;  %v5274_v38 = vld [vmem:[#allocation16 + $0x78] sm:$0xff] }
 0x1e5   :  { %2618 = vmatpush.bf16.msra.mxu2 %v3716_v32  ;;  %2640 = vmatpush.bf16.msrb.mxu0 %v4356_v33  ;;  %v4040_v33 = vor.u32 %v5094_v34, %v4037_v35  ;;  %v4581_v27 = vld [vmem:[#allocation13 + $0x738] sm:$0xf0] }
 0x1e6   :  { %2633 = vmatmul.bf16.vlgmr.msra.gmra.mxu3 %v5726_v44  ;;  %v5174_v31 = vld [vmem:[#allocation13 + $0x55c] sm:$0xf] }
 0x1e7   :  { %2677 = vmatpush.bf16.msrb.mxu3 %v4168_v41  ;;  %2655 = vmatpush.bf16.msrb.mxu1 %v4548_v59  ;;  %v5038_v41 = vld [vmem:[#allocation13 + $0x11c] sm:$0xf]  ;;  %v2363_v32 = vpop.f32.mrf.mxu2  ;;  %v5138_v59 = vld [vmem:[#allocation13 + $0x434] sm:$0xf0] }
 0x1e8   :  { %v3816_v51 = vor.u32 %v5038_v41, %v3813_v42  ;;  %v4357_v34 = vld [vmem:[#allocation13 + $0x578] sm:$0xf0] }
 0x1e9   :  { %2619 = vmatpush.bf16.msra.mxu2 %v3684_v62  ;;  %2641 = vmatpush.bf16.msrb.mxu0 %v4324_v63  ;;  %v5773_v57 = vpop.f32.mrf.mxu0  ;;  %v5775_v58 = vpop.f32.mrf.mxu3  ;;  %v5190_v62 = vld [vmem:[#allocation13 + $0x5dc] sm:$0xf]  ;;  %v4360_v40 = vor.u32 %v5174_v31, %v4357_v34 }
 0x1ea   :  { %v4421_v63 = vld [vmem:[#allocation13 + $0x5f8] sm:$0xf0] }
 0x1eb   :  { %2678 = vmatpush.bf16.msrb.mxu3 %v4136_v60  ;;  %2656 = vmatpush.bf16.msrb.mxu1 %v4516_v10  ;;  %v5030_v60 = vld [vmem:[#allocation13 + $0xdc] sm:$0xf]  ;;  %v2402_v0 = vpop.f32.mrf.mxu1  ;;  %v4424_v9 = vor.u32 %v5190_v62, %v4421_v63 }
 0x1ec   :  { %2620 = vmatmul.bf16.vlgmr.msra.gmra.mxu2 %v5729_v55  ;;  %v3784_v5 = vor.u32 %v5030_v60, %v3781_v61  ;;  %v4613_v10 = vld [vmem:[#allocation13 + $0x778] sm:$0xf0]  ;;  %v5266_v60 = vld [vmem:[#allocation16 + $0x38] sm:$0xff] }
 0x1ed   :  { %2664 = vmatpush.bf16.msrb.mxu2 %v3912_v4  ;;  %2642 = vmatpush.bf16.msrb.mxu0 %v4292_v13  ;;  %v4196_v4 = vor.u32 %v5138_v59, %v4195_v56  ;;  %v3749_v13 = vld [vmem:[#allocation13 + $0xb8] sm:$0xf0]  ;;  %v4616_v18 = vor.u32 %v5238_v8, %v4613_v10  ;;  %v5271_v10 = vld [vmem:[#allocation16 + $0x60] sm:$0xff] }
 0x1ee   :  { %v5222_v41 = vld [vmem:[#allocation13 + $0x6dc] sm:$0xf] }
 0x1ef   :  { %2679 = vmatpush.bf16.msrb.mxu3 %v4104_v12  ;;  %2657 = vmatpush.bf16.msrb.mxu1 %v4484_v26  ;;  %v5022_v12 = vld [vmem:[#allocation13 + $0x9c] sm:$0xf] }
 0x1f0   :  { %v3752_v19 = vor.u32 %v5022_v12, %v3749_v13  ;;  %v5230_v26 = vld [vmem:[#allocation13 + $0x71c] sm:$0xf] }
 0x1f1   :  { %2665 = vmatpush.bf16.msrb.mxu2 %v3880_v17  ;;  %2643 = vmatpush.bf16.msrb.mxu0 %v4260_v30  ;;  %v5778_v17 = vpop.f32.mrf.mxu2  ;;  %v2389_v22 = vpop.f32.mrf.mxu0  ;;  %v3717_v30 = vld [vmem:[#allocation13 + $0x78] sm:$0xf0]  ;;  %v4584_v37 = vor.u32 %v5230_v26, %v4581_v27  ;;  %v5263_v26 = vld [vmem:[#allocation16 + $0x20] sm:$0xff] }
 0x1f2   :  { %v2428_v24 = vpop.f32.mrf.mxu3  ;;  %v4549_v42 = vld [vmem:[#allocation13 + $0x6f8] sm:$0xf0]  ;;  %v5270_v22 = vld [vmem:[#allocation16 + $0x58] sm:$0xff] }
 0x1f3   :  { %2680 = vmatpush.bf16.msrb.mxu3 %v4072_v29  ;;  %2658 = vmatpush.bf16.msrb.mxu1 %v4452_v43  ;;  %v5014_v29 = vld [vmem:[#allocation13 + $0x5c] sm:$0xf]  ;;  %v5781_v35 = vpop.f32.mrf.mxu1  ;;  %v4552_v48 = vor.u32 %v5222_v41, %v4549_v42  ;;  %v5288_v41 = vld [vmem:[#allocation16 + $0xe8] sm:$0xff] }
 0x1f4   :  { %v3720_v39 = vor.u32 %v5014_v29, %v3717_v30  ;;  %v5006_v43 = vld [vmem:[#allocation13 + $0x1c] sm:$0xf] }
 0x1f5   :  { %2666 = vmatpush.bf16.msrb.mxu2 %v3848_v36  ;;  %2644 = vmatpush.bf16.msrb.mxu0 %v4228_v50  ;;  %v3944_v36 = vor.u32 %v5070_v20, %v3941_v21  ;;  %v3685_v32 = vld [vmem:[#allocation13 + $0x38] sm:$0xf0] }
 0x1f6   :  { %2659 = vmatmul.bf16.vlgmr.msrb.gmra.mxu1 %v5734_v23  ;;  %v5273_v50 = vld [vmem:[#allocation16 + $0x70] sm:$0xff] }
 0x1f7   :  { %2681 = vmatpush.bf16.msrb.mxu3 %v4040_v33  ;;  %2703 = vmatpush.bf16.msra.mxu1 %v4680_v46  ;;  %v5166_v33 = vld [vmem:[#allocation13 + $0x51c] sm:$0xf] }
 0x1f8   :  { %v4325_v46 = vld [vmem:[#allocation13 + $0x538] sm:$0xf0] }
 0x1f9   :  { %2667 = vmatpush.bf16.msrb.mxu2 %v3816_v51  ;;  %2645 = vmatpush.bf16.msrb.mxu0 %v4196_v4  ;;  %v2415_v47 = vpop.f32.mrf.mxu2  ;;  %v3688_v51 = vor.u32 %v5006_v43, %v3685_v32  ;;  %v4328_v52 = vor.u32 %v5166_v33, %v4325_v46  ;;  %v5214_v53 = vld [vmem:[#allocation13 + $0x69c] sm:$0xf]  ;;  %v5784_v59 = vpop.f32.mrf.mxu0  ;;  %v1007_v33 = vperm.slane %v5758_v49, 3 }
 0x1fa   :  { %v4517_v56 = vld [vmem:[#allocation13 + $0x6b8] sm:$0xf0]  ;;  %v5287_v47 = vld [vmem:[#allocation16 + $0xe0] sm:$0xff] }
 0x1fb   :  { %2682 = vmatpush.bf16.msrb.mxu3 %v4008_v1  ;;  %2704 = vmatpush.bf16.msra.mxu1 %v4648_v2  ;;  %v5158_v61 = vld [vmem:[#allocation13 + $0x4dc] sm:$0xf]  ;;  %v2454_v63 = vpop.f32.mrf.mxu1  ;;  %v4520_v0 = vor.u32 %v5214_v53, %v4517_v56  ;;  %v5272_v1 = vld [vmem:[#allocation16 + $0x68] sm:$0xff]  ;;  %v1006_v53 = vperm.slane %v5758_v49, 2  ;;  %v5286_v56 = vld [vmem:[#allocation16 + $0xd8] sm:$0xff] }
 0x1fc   :  { %2646 = vmatmul.bf16.vlgmr.msrb.gmra.mxu0 %v5738_v45  ;;  %v4293_v62 = vld [vmem:[#allocation13 + $0x4f8] sm:$0xf0]  ;;  %v5298_v63 = vld [vmem:[#allocation16 + $0x138] sm:$0xff] }
 0x1fd   :  { %2668 = vmatpush.bf16.msrb.mxu2 %v3784_v5  ;;  %2690 = vmatpush.bf16.msra.mxu0 %v4424_v9  ;;  %v4296_v2 = vor.u32 %v5158_v61, %v4293_v62  ;;  %v5206_v4 = vld [vmem:[#allocation13 + $0x65c] sm:$0xf]  ;;  %v2728_v61 = vmax.f32 %v5765_v3, 0.0  ;;  %v5279_v62 = vld [vmem:[#allocation16 + $0xa0] sm:$0xff] }
 0x1fe   :  { %v4485_v5 = vld [vmem:[#allocation13 + $0x678] sm:$0xf0] }
 0x1ff   :  { %2683 = vmatpush.bf16.msrb.mxu3 %v3976_v16  ;;  %2705 = vmatpush.bf16.msra.mxu1 %v4616_v18  ;;  %v5265_v6 = vld [vmem:[#allocation16 + $0x30] sm:$0xff]  ;;  %v4488_v9 = vor.u32 %v5206_v4, %v4485_v5  ;;  %v5264_v16 = vld [vmem:[#allocation16 + $0x28] sm:$0xff]  ;;  %v2736_v5 = vpack.c.bf16 %v2728_v61, %v2728_v61 }
 0x200   :  { %v5150_v7 = vld [vmem:[#allocation13 + $0x49c] sm:$0xf] }
 0x201   :  { %2669 = vmatpush.bf16.msrb.mxu2 %v3752_v19  ;;  %2691 = vmatpush.bf16.msra.mxu0 %v4392_v25  ;;  %v4261_v8 = vld [vmem:[#allocation13 + $0x4b8] sm:$0xf0]  ;;  %v2441_v15 = vpop.f32.mrf.mxu0 }
 0x202   :  { %v4264_v12 = vor.u32 %v5150_v7, %v4261_v8  ;;  %v5198_v13 = vld [vmem:[#allocation13 + $0x61c] sm:$0xf]  ;;  %v5278_v7 = vld [vmem:[#allocation16 + $0x98] sm:$0xff] }
 0x203   :  { %2684 = vmatpush.bf16.msrb.mxu3 %v3944_v36  ;;  %2706 = vmatpush.bf16.msra.mxu1 %v4584_v37  ;;  %v4453_v14 = vld [vmem:[#allocation13 + $0x638] sm:$0xf0]  ;;  %v5262_v37 = vld [vmem:[#allocation16 + $0x18] sm:$0xff] }
 0x204   :  { %v5142_v18 = vld [vmem:[#allocation13 + $0x45c] sm:$0xf]  ;;  %v4456_v21 = vor.u32 %v5198_v13, %v4453_v14  ;;  %v5296_v14 = vld [vmem:[#allocation16 + $0x128] sm:$0xff] }
 0x205   :  { %2670 = vmatpush.bf16.msrb.mxu2 %v3720_v39  ;;  %2692 = vmatpush.bf16.msra.mxu0 %v4360_v40  ;;  %v4229_v19 = vld [vmem:[#allocation13 + $0x478] sm:$0xf0]  ;;  %v5268_v40 = vld [vmem:[#allocation16 + $0x48] sm:$0xff] }
 0x206   :  { %2685 = vmatmul.bf16.vlgmr.msrb.gmra.mxu3 %v5726_v44  ;;  %v1005_v44 = vperm.slane %v5758_v49, 1  ;;  %v4232_v25 = vor.u32 %v5142_v18, %v4229_v19  ;;  %v5134_v27 = vld [vmem:[#allocation13 + $0x41c] sm:$0xf]  ;;  %v5283_v18 = vld [vmem:[#allocation16 + $0xc0] sm:$0xff] }
 0x207   :  { %3273 = vmatpush.bf16.msra.mxu3 %v5274_v38  ;;  %2707 = vmatpush.bf16.msra.mxu1 %v4552_v48  ;;  %v4197_v29 = vld [vmem:[#allocation13 + $0x438] sm:$0xf0]  ;;  %v5282_v38 = vld [vmem:[#allocation16 + $0xb8] sm:$0xff]  ;;  %v5260_v48 = vld [vmem:[#allocation16 + $0x8] sm:$0xff] }
 0x208   :  { %v2362_v20 = vadd.f32 %v5768_v11, %v1005_v44  ;;  %v5269_v31 = vld [vmem:[#allocation16 + $0x50] sm:$0xff]  ;;  %v4200_v36 = vor.u32 %v5134_v27, %v4197_v29  ;;  %v5306_v44 = vld [vmem:[#allocation16 + $0x178] sm:$0xff]  ;;  %v1008_v29 = vperm.slane %v5758_v49, 4 }
 0x209   :  { %2671 = vmatpush.bf16.msrb.mxu2 %v3688_v51  ;;  %2693 = vmatpush.bf16.msra.mxu0 %v4328_v52  ;;  %v2478_v24 = vpop.f32.mrf.mxu3  ;;  %v5289_v34 = vld [vmem:[#allocation16 + $0xf0] sm:$0xff] }
 0x20a   :  { %v2375_v30 = vadd.f32 %v5763_v54, %v2362_v20  ;;  %v5261_v43 = vld [vmem:[#allocation16 + $0x10] sm:$0xff] }
 0x20b   :  { %3274 = vmatpush.bf16.msra.mxu3 %v5273_v50  ;;  %2708 = vmatpush.bf16.msra.mxu1 %v4520_v0  ;;  %v5285_v4 = vld [vmem:[#allocation16 + $0xd0] sm:$0xff] }
 0x20c   :  { %2672 = vmatmul.bf16.vlgmr.msrb.gmra.mxu2 %v5729_v55  ;;  %v5290_v55 = vld [vmem:[#allocation16 + $0xf8] sm:$0xff]  ;;  %v2388_v11 = vadd.f32 %v5773_v57, %v2375_v30  ;;  %v5281_v57 = vld [vmem:[#allocation16 + $0xb0] sm:$0xff] }
 0x20d   :  { %3260 = vmatpush.bf16.msra.mxu2 %v5266_v60  ;;  %2694 = vmatpush.bf16.msra.mxu0 %v4296_v2  ;;  %v2414_v2 = vadd.f32 %v5778_v17, %v1006_v53  ;;  %v5297_v8 = vld [vmem:[#allocation16 + $0x130] sm:$0xff] }
 0x20e   :  { %v2401_v54 = vadd.f32 %v5771_v28, %v2388_v11  ;;  %v5280_v28 = vld [vmem:[#allocation16 + $0xa8] sm:$0xff]  ;;  %v5305_v3 = vld [vmem:[#allocation16 + $0x170] sm:$0xff] }
 0x20f   :  { %3275 = vmatpush.bf16.msra.mxu3 %v5272_v1  ;;  %2709 = vmatpush.bf16.msra.mxu1 %v4488_v9  ;;  %v2465_v39 = vpop.f32.mrf.mxu2  ;;  %v2427_v9 = vadd.f32 %v5775_v58, %v2414_v2  ;;  %v5277_v17 = vld [vmem:[#allocation16 + $0x90] sm:$0xff]  ;;  %v5295_v58 = vld [vmem:[#allocation16 + $0x120] sm:$0xff] }
 0x210   :  { %v2729_v46 = vmax.f32 %v2401_v54, 0.0  ;;  %v2466_v51 = vadd.f32 %v2465_v39, %v1007_v33  ;;  %v5291_v54 = vld [vmem:[#allocation16 + $0x100] sm:$0xff] }
 0x211   :  { %3261 = vmatpush.bf16.msra.mxu2 %v5265_v6  ;;  %2695 = vmatpush.bf16.msra.mxu0 %v4264_v12  ;;  %v2480_v42 = vpop.f32.mrf.mxu3  ;;  %v2440_v15 = vadd.f32 %v5784_v59, %v2427_v9 }
 0x212   :  { %v2737_v52 = vpack.c.bf16 %v2729_v46, %v2729_v46  ;;  %v2479_v1 = vadd.f32 %v2478_v24, %v2466_v51  ;;  %v5275_v24 = vld [vmem:[#allocation16 + $0x80] sm:$0xff]  ;;  %v5314_v46 = vld [vmem:[#allocation16 + $0x1b8] sm:$0xff] }
 0x213   :  { %3276 = vmatpush.bf16.msra.mxu3 %v5271_v10  ;;  %2710 = vmatpush.bf16.msra.mxu1 %v4456_v21  ;;  %v2504_v32 = vpop.f32.mrf.mxu1  ;;  %v5284_v10 = vld [vmem:[#allocation16 + $0xc8] sm:$0xff] }
 0x214   :  { %v5276_v21 = vld [vmem:[#allocation16 + $0x88] sm:$0xff] }
 0x215   :  { %3262 = vmatpush.bf16.msra.mxu2 %v5264_v16  ;;  %2696 = vmatpush.bf16.msra.mxu0 %v4232_v25  ;;  %v5304_v16 = vld [vmem:[#allocation16 + $0x168] sm:$0xff]  ;;  %v5294_v25 = vld [vmem:[#allocation16 + $0x118] sm:$0xff] }
 0x216   :  { %2711 = vmatmul.bf16.vlgmr.msra.gmra.mxu1 %v5734_v23  ;;  %v5267_v23 = vld [vmem:[#allocation16 + $0x40] sm:$0xff] }
 0x217   :  { %3277 = vmatpush.bf16.msra.mxu3 %v5270_v22  ;;  %3299 = vmatpush.bf16.msrb.mxu1 %v5290_v55  ;;  %v2467_v50 = vpop.f32.mrf.mxu2  ;;  %v2453_v22 = vadd.f32 %v5781_v35, %v2440_v15  ;;  %v5302_v35 = vld [vmem:[#allocation16 + $0x158] sm:$0xff] }
 0x218   :  { %v5312_v50 = vld [vmem:[#allocation16 + $0x1a8] sm:$0xff] }
 0x219   :  { %3263 = vmatpush.bf16.msra.mxu2 %v5263_v26  ;;  %2697 = vmatpush.bf16.msra.mxu0 %v4200_v36  ;;  %v2491_v60 = vpop.f32.mrf.mxu0  ;;  %v2730_v59 = vmax.f32 %v2453_v22, 0.0  ;;  %v5303_v26 = vld [vmem:[#allocation16 + $0x160] sm:$0xff] }
 0x21a   :  { %v2492_v6 = vadd.f32 %v2491_v60, %v2479_v1 }
 0x21b   :  { %3278 = vmatpush.bf16.msra.mxu3 %v5269_v31  ;;  %3300 = vmatpush.bf16.msrb.mxu1 %v5289_v34  ;;  %v2506_v0 = vpop.f32.mrf.mxu1  ;;  %v5293_v31 = vld [vmem:[#allocation16 + $0x110] sm:$0xff]  ;;  %v2738_v34 = vpack.c.bf16 %v2730_v59, %v2730_v59 }
 0x21c   :  { %2698 = vmatmul.bf16.vlgmr.msra.gmra.mxu0 %v5738_v45  ;;  %v5259_v45 = vld [vmem:[#allocation16] sm:$0xff]  ;;  %v2505_v13 = vadd.f32 %v2504_v32, %v2492_v6 }
 0x21d   :  { %3264 = vmatpush.bf16.msra.mxu2 %v5262_v37  ;;  %3286 = vmatpush.bf16.msrb.mxu0 %v5282_v38  ;;  %v5292_v37 = vld [vmem:[#allocation16 + $0x108] sm:$0xff]  ;;  %v5301_v38 = vld [vmem:[#allocation16 + $0x150] sm:$0xff] }
 0x21e   :  { %v2731_v19 = vmax.f32 %v2505_v13, 0.0  ;;  %v5320_v13 = vld [vmem:[#allocation16 + $0x1e8] sm:$0xff] }
 0x21f   :  { %3279 = vmatpush.bf16.msra.mxu3 %v5268_v40  ;;  %3301 = vmatpush.bf16.msrb.mxu1 %v5288_v41 }
 0x220   :  { %v2739_v55 = vpack.c.bf16 %v2731_v19, %v2731_v19  ;;  %v5318_v19 = vld [vmem:[#allocation16 + $0x1d8] sm:$0xff] }
 0x221   :  { %3265 = vmatpush.bf16.msra.mxu2 %v5261_v43  ;;  %3287 = vmatpush.bf16.msrb.mxu0 %v5281_v57  ;;  %v2493_v12 = vpop.f32.mrf.mxu0  ;;  %v5300_v43 = vld [vmem:[#allocation16 + $0x148] sm:$0xff] }
 0x223   :  { %3280 = vmatpush.bf16.msra.mxu3 %v5267_v23  ;;  %3302 = vmatpush.bf16.msrb.mxu1 %v5287_v47  ;;  %v5299_v23 = vld [vmem:[#allocation16 + $0x140] sm:$0xff] }
 0x225   :  { %3266 = vmatpush.bf16.msra.mxu2 %v5260_v48  ;;  %3288 = vmatpush.bf16.msrb.mxu0 %v5280_v28  ;;  %v5313_v48 = vld [vmem:[#allocation16 + $0x1b0] sm:$0xff] }
 0x226   :  { %3281 = vmatmul.bf16.vlgmr.msra.gmra.mxu3 %v2737_v52  ;;  %v5311_v52 = vld [vmem:[#allocation16 + $0x1a0] sm:$0xff] }
 0x227   :  { %3303 = vmatpush.bf16.msrb.mxu1 %v5286_v56  ;;  %3325 = vmatpush.bf16.msrb.mxu3 %v5306_v44  ;;  %v1009_v56 = vperm.slane %v5758_v49, 5 }
 0x229   :  { %3267 = vmatpush.bf16.msra.mxu2 %v5259_v45  ;;  %3289 = vmatpush.bf16.msrb.mxu0 %v5279_v62  ;;  %v2530_v20 = vpop.f32.mrf.mxu3  ;;  %v5310_v45 = vld [vmem:[#allocation16 + $0x198] sm:$0xff] }
 0x22b   :  { %3304 = vmatpush.bf16.msrb.mxu1 %v5285_v4  ;;  %3326 = vmatpush.bf16.msrb.mxu3 %v5305_v3  ;;  %v5308_v4 = vld [vmem:[#allocation16 + $0x188] sm:$0xff]  ;;  %v5322_v3 = vld [vmem:[#allocation16 + $0x1f8] sm:$0xff] }
 0x22c   :  { %3268 = vmatmul.bf16.vlgmr.msra.gmra.mxu2 %v2736_v5 }
 0x22d   :  { %3312 = vmatpush.bf16.msrb.mxu2 %v5298_v63  ;;  %3290 = vmatpush.bf16.msrb.mxu0 %v5278_v7  ;;  %v5309_v63 = vld [vmem:[#allocation16 + $0x190] sm:$0xff] }
 0x22f   :  { %3305 = vmatpush.bf16.msrb.mxu1 %v5284_v10  ;;  %3327 = vmatpush.bf16.msrb.mxu3 %v5304_v16  ;;  %v2517_v27 = vpop.f32.mrf.mxu2  ;;  %v5321_v10 = vld [vmem:[#allocation16 + $0x1f0] sm:$0xff]  ;;  %v1010_v16 = vperm.slane %v5758_v49, 6 }
 0x230   :  { %v2518_v36 = vadd.f32 %v2517_v27, %v1008_v29  ;;  %v5315_v29 = vld [vmem:[#allocation16 + $0x1c0] sm:$0xff] }
 0x231   :  { %3313 = vmatpush.bf16.msrb.mxu2 %v5297_v8  ;;  %3291 = vmatpush.bf16.msrb.mxu0 %v5277_v17  ;;  %v2532_v30 = vpop.f32.mrf.mxu3  ;;  %v5307_v8 = vld [vmem:[#allocation16 + $0x180] sm:$0xff] }
 0x232   :  { %v2531_v40 = vadd.f32 %v2530_v20, %v2518_v36  ;;  %v1011_v36 = vperm.slane %v5758_v49, 7 }
 0x233   :  { %3306 = vmatpush.bf16.msrb.mxu1 %v5283_v18  ;;  %3328 = vmatpush.bf16.msrb.mxu3 %v5303_v26  ;;  %v2556_v11 = vpop.f32.mrf.mxu1 }
 0x235   :  { %3314 = vmatpush.bf16.msrb.mxu2 %v5296_v14  ;;  %3292 = vmatpush.bf16.msrb.mxu0 %v5276_v21  ;;  %v5319_v14 = vld [vmem:[#allocation16 + $0x1e0] sm:$0xff] }
 0x236   :  { %3307 = vmatmul.bf16.vlgmr.msrb.gmra.mxu1 %v2739_v55 }
 0x237   :  { %3329 = vmatpush.bf16.msrb.mxu3 %v5302_v35  ;;  %v2519_v39 = vpop.f32.mrf.mxu2  ;;  %3351 = vmatpush.bf16.msra.mxu1 %v5322_v3 }
 0x239   :  { %3315 = vmatpush.bf16.msrb.mxu2 %v5295_v58  ;;  %3293 = vmatpush.bf16.msrb.mxu0 %v5275_v24  ;;  %v2543_v41 = vpop.f32.mrf.mxu0  ;;  %v5317_v58 = vld [vmem:[#allocation16 + $0x1d0] sm:$0xff]  ;;  %v5316_v24 = vld [vmem:[#allocation16 + $0x1c8] sm:$0xff] }
 0x23a   :  { %v2544_v42 = vadd.f32 %v2543_v41, %v2531_v40 }
 0x23b   :  { %3330 = vmatpush.bf16.msrb.mxu3 %v5301_v38  ;;  %v2558_v57 = vpop.f32.mrf.mxu1  ;;  %3352 = vmatpush.bf16.msra.mxu1 %v5321_v10 }
 0x23c   :  { %3294 = vmatmul.bf16.vlgmr.msrb.gmra.mxu0 %v2738_v34  ;;  %v2557_v32 = vadd.f32 %v2556_v11, %v2544_v42 }
 0x23d   :  { %3316 = vmatpush.bf16.msrb.mxu2 %v5294_v25  ;;  %3338 = vmatpush.bf16.msra.mxu0 %v5314_v46 }
 0x23e   :  { %v2732_v33 = vmax.f32 %v2557_v32, 0.0 }
 0x23f   :  { %3331 = vmatpush.bf16.msrb.mxu3 %v5300_v43  ;;  %3353 = vmatpush.bf16.msra.mxu1 %v5320_v13 }
 0x240   :  { %v2740_v47 = vpack.c.bf16 %v2732_v33, %v2732_v33 }
 0x241   :  { %3317 = vmatpush.bf16.msrb.mxu2 %v5293_v31  ;;  %v2545_v28 = vpop.f32.mrf.mxu0  ;;  %3339 = vmatpush.bf16.msra.mxu0 %v5313_v48 }
 0x243   :  { %3332 = vmatpush.bf16.msrb.mxu3 %v5299_v23  ;;  %3354 = vmatpush.bf16.msra.mxu1 %v5319_v14 }
 0x245   :  { %3318 = vmatpush.bf16.msrb.mxu2 %v5292_v37  ;;  %3340 = vmatpush.bf16.msra.mxu0 %v5312_v50 }
 0x247   :  { %3355 = vmatpush.bf16.msra.mxu1 %v5318_v19 }
 0x249   :  { %3319 = vmatpush.bf16.msrb.mxu2 %v5291_v54  ;;  %v2582_v51 = vpop.f32.mrf.mxu3  ;;  %3341 = vmatpush.bf16.msra.mxu0 %v5311_v52 }
 0x24b   :  { %3356 = vmatpush.bf16.msra.mxu1 %v5317_v58 }
 0x24c   :  { %3320 = vmatmul.bf16.vlgmr.msrb.gmra.mxu2 %v2740_v47  ;;  %v5341_v47 = vld [vmem:[%s5821_s10] ss:$0 sm:$0xff]  ;;  %s5617_s10 = smov [#allocation17]  }
 0x24d   :  { %3342 = vmatpush.bf16.msra.mxu0 %v5310_v45  ;;  %s3375_s23 = sshll.u32 %s5617_s10, 4  ;;  %s3376_s23 = int_to_ptr.vmem [resolvable:$true] %s3375_s23 }
 0x24f   :  { %v2569_v53 = vpop.f32.mrf.mxu2  ;;  %3357 = vmatpush.bf16.msra.mxu1 %v5316_v24 }
 0x250   :  { %v2570_v62 = vadd.f32 %v2569_v53, %v1009_v56 }
 0x251   :  { %v2584_v60 = vpop.f32.mrf.mxu3  ;;  %3343 = vmatpush.bf16.msra.mxu0 %v5309_v63 }
 0x252   :  { %v2583_v1 = vadd.f32 %v2582_v51, %v2570_v62 }
 0x253   :  { %v2608_v61 = vpop.f32.mrf.mxu1  ;;  %3358 = vmatpush.bf16.msra.mxu1 %v5315_v29 }
 0x255   :  { %3344 = vmatpush.bf16.msra.mxu0 %v5308_v4 }
 0x257   :  { %v2571_v0 = vpop.f32.mrf.mxu2 }
 0x259   :  { %v2595_v2 = vpop.f32.mrf.mxu0  ;;  %3345 = vmatpush.bf16.msra.mxu0 %v5307_v8 }
 0x25a   :  { %v2596_v5 = vadd.f32 %v2595_v2, %v2583_v1 }
 0x25b   :  { %v2610_v6 = vpop.f32.mrf.mxu1 }
 0x25c   :  { %v2609_v7 = vadd.f32 %v2608_v61, %v2596_v5 }
 0x25e   :  { %v2733_v44 = vmax.f32 %v2609_v7, 0.0 }
 0x260   :  { %v2741_v9 = vpack.c.bf16 %v2733_v44, %v2733_v44 }
 0x261   :  { %v2597_v12 = vpop.f32.mrf.mxu0 }
 0x262   :  { %3333 = vmatmul.bf16.vlgmr.msrb.gmra.mxu3 %v2741_v9 }
 0x269   :  { %v2634_v17 = vpop.f32.mrf.mxu3 }
 0x26f   :  { %v2621_v15 = vpop.f32.mrf.mxu2 }
 0x270   :  { %v2622_v21 = vadd.f32 %v2621_v15, %v1010_v16 }
 0x271   :  { %v2636_v18 = vpop.f32.mrf.mxu3 }
 0x272   :  { %v2635_v55 = vadd.f32 %v2634_v17, %v2622_v21 }
 0x273   :  { %v2660_v20 = vpop.f32.mrf.mxu1 }
 0x277   :  { %v2623_v22 = vpop.f32.mrf.mxu2 }
 0x279   :  { %v2647_v25 = vpop.f32.mrf.mxu0 }
 0x27a   :  { %v2648_v59 = vadd.f32 %v2647_v25, %v2635_v55 }
 0x27b   :  { %v2662_v26 = vpop.f32.mrf.mxu1 }
 0x27c   :  { %v2661_v27 = vadd.f32 %v2660_v20, %v2648_v59 }
 0x27e   :  { %v2734_v30 = vmax.f32 %v2661_v27, 0.0 }
 0x280   :  { %v2742_v31 = vpack.c.bf16 %v2734_v30, %v2734_v30 }
 0x281   :  { %v2649_v34 = vpop.f32.mrf.mxu0 }
 0x282   :  { %3346 = vmatmul.bf16.vlgmr.msra.gmra.mxu0 %v2742_v31 }
 0x289   :  { %v2686_v35 = vpop.f32.mrf.mxu3 }
 0x28f   :  { %v2673_v11 = vpop.f32.mrf.mxu2 }
 0x290   :  { %v2674_v39 = vadd.f32 %v2673_v11, %v1011_v36 }
 0x291   :  { %v2688_v37 = vpop.f32.mrf.mxu3 }
 0x292   :  { %v2687_v54 = vadd.f32 %v2686_v35, %v2674_v39 }
 0x293   :  { %v2712_v38 = vpop.f32.mrf.mxu1 }
 0x297   :  { %v2675_v40 = vpop.f32.mrf.mxu2 }
 0x299   :  { %v2699_v41 = vpop.f32.mrf.mxu0 }
 0x29a   :  { %v2700_v42 = vadd.f32 %v2699_v41, %v2687_v54 }
 0x29b   :  { %v2714_v43 = vpop.f32.mrf.mxu1 }
 0x29c   :  { %v2713_v57 = vadd.f32 %v2712_v38, %v2700_v42 }
 0x29e   :  { %v2735_v32 = vmax.f32 %v2713_v57, 0.0 }
 0x2a0   :  { %v2743_v33 = vpack.c.bf16 %v2735_v32, %v2735_v32 }
 0x2a1   :  { %v2701_v23 = vpop.f32.mrf.mxu0 }
 0x2a2   :  { %3359 = vmatmul.bf16.vlgmr.msra.gmra.mxu1 %v2743_v33 }
 0x2a9   :  { %v3282_v46 = vpop.f32.mrf.mxu3 }
 0x2af   :  { %v3269_v48 = vpop.f32.mrf.mxu2 }
 0x2b0   :  { %v3270_v49 = vadd.f32 %v5341_v47, %v3269_v48 }
 0x2b1   :  { %v3284_v28 = vpop.f32.mrf.mxu3 }
 0x2b2   :  { %v3283_v50 = vadd.f32 %v3282_v46, %v3270_v49 }
 0x2b3   :  { %v3308_v51 = vpop.f32.mrf.mxu1 }
 0x2b7   :  { %v3271_v52 = vpop.f32.mrf.mxu2 }
 0x2b9   :  { %v3295_v53 = vpop.f32.mrf.mxu0 }
 0x2ba   :  { %v3296_v56 = vadd.f32 %v3295_v53, %v3283_v50 }
 0x2bb   :  { %v3310_v60 = vpop.f32.mrf.mxu1 }
 0x2bc   :  { %v3309_v45 = vadd.f32 %v3308_v51, %v3296_v56 }
 0x2c1   :  { %v3297_v61 = vpop.f32.mrf.mxu0 }
 0x2cf   :  { %v3321_v62 = vpop.f32.mrf.mxu2 }
 0x2d0   :  { %v3322_v63 = vadd.f32 %v3321_v62, %v3309_v45 }
 0x2d7   :  { %v3323_v0 = vpop.f32.mrf.mxu2 }
 0x2e5   :  { %v3334_v1 = vpop.f32.mrf.mxu3 }
 0x2e6   :  { %v3335_v6 = vadd.f32 %v3334_v1, %v3322_v63 }
 0x2ed   :  { %v3336_v2 = vpop.f32.mrf.mxu3 }
 0x2ff   :  { %v3347_v4 = vpop.f32.mrf.mxu0 }
 0x300   :  { %v3348_v7 = vadd.f32 %v3347_v4, %v3335_v6 }
 0x307   :  { %v3349_v5 = vpop.f32.mrf.mxu0 }
 0x31f   :  { %v3360_v8 = vpop.f32.mrf.mxu1 }
 0x320   :  { %v3361_v44 = vadd.f32 %v3360_v8, %v3348_v7 }
 0x322   :  { %v3364_v3 = vsub.f32 0.0, %v3361_v44 }
 0x324   :  { %v3365_v9 = vmul.f32 1.442695, %v3364_v3 }
 0x326   :  { %5344 = vpow2.f32 %v3365_v9 }
 0x327   :  { %v3362_v10 = vpop.f32.mrf.mxu1 }
 0x32c   :  { %v5345_v12 = vpop.eup %5344 }
 0x32d   :  { %v3367_v13 = vadd.f32 1.0, %v5345_v12 }
 0x32f   :  { %5346 = vrcp.f32 %v3367_v13 }
 0x335   :  { %v5347_v17 = vpop.eup %5346 }
 0x336   :  { %3369 = vst [vmem:[#allocation17] sm:$0xff] %v5347_v17 }
 0x337   :  { %3380 = dma.vmem_to_hbm [thread:$0]  %s3376_s23, 128, %s3378_s26, [#allocation4]  }
 0x338   :  { %5598 = dma.done.wait [#allocation4], 128  }
 0x339   :  { %5599 = vsyncadd [#allocation4], 4294967168 }
 0x33a   :  { %3385 = vsyncpa [#allocation3], 1 }
 0x33b   :  { %3386 = vsyncpa [#allocation6], 1 }
 0x33c   :  { %3387 = vsyncpa [#allocation9], 1 }
 0x33d   :  { %3388 = vsyncpa [#allocation12], 1 }
 0x33e   :  { %3389 = vsyncpa [#allocation15], 1 }
 0x33f   :  { %3390 = vsyncpa [#allocation4], 1 }

</bundles_post_ra>
